<compile_context>
chip_gen: v7x
topology: tpu7x:2x2x1
jax: 0.10.0
libtpu: 0.0.40
codegen_flags: <defaults>
</compile_context>

<pallas_src>
import functools

import jax
import jax.numpy as jnp
import numpy as np
from jax.experimental import pallas as pl
from jax.experimental.pallas import tpu as pltpu


# ----------------------------------------------------------------------------
# Pallas kernel: fused 3-stage per-sample convolution (one grid step = one
# batch element; per-sample expert-mixed weights & biases).
# ----------------------------------------------------------------------------
def _fused_conv3_kernel(x_ref, w1_ref, w2_ref, w3_ref, b1_ref, b2_ref, b3_ref,
                        o_ref, p2_ref, p3_ref, *, K, padding, dilation, geom):
    """Per-sample fused conv chain.

    x_ref : (Cin, Lext1)   padded-flat stage-1 input (f32), zero-extended tail
    wN_ref: (Cout, C*K*K)  expert-mixed weights (bf16), tap-major / channel-minor
    bN_ref: (Cout, 1)      expert-mixed bias (f32)
    o_ref : (Cout, L3)     stage-3 result over the stage-3 padded-flat grid
    pN_ref: (Cout, LextN)  VMEM scratch: padded-flat input buffer of stage N
    """
    (_, Wp1, Ho1, Wo1, L1, _), (_, Wp2, Ho2, Wo2, L2, _), (_, Wp3, _, _, L3, _) = geom

    def conv_stage(xpad, w_ref, b_ref, Wp, L):
        # One fused MXU contraction over (ky, kx, channel): the im2col slab is
        # built from K*K shifted lane-slices of the padded-flat activation.
        # Columns at padded positions with y >= Ho or x >= Wo are junk and are
        # ignored (masked out) by the next stage / the final JAX-side slice.
        taps = []
        for ky in range(K):
            for kx in range(K):
                s = (ky * Wp + kx) * dilation
                taps.append(xpad[:, s:s + L])
        slab = jnp.concatenate(taps, axis=0).astype(jnp.bfloat16)    # (C*K*K, L)
        acc = jnp.dot(w_ref[...], slab,
                      preferred_element_type=jnp.float32)            # (Cout, L)
        return acc + b_ref[...]                                      # bias bcast over lanes

    def repad(p_ref, y_full, Wp_src, Ho, Wo):
        # Scatter the valid (Ho, Wo) outputs (top-left corner of the previous
        # stage's padded-flat grid) into the zeroed padded-flat buffer of the
        # next stage, leaving a `padding`-wide zero border and zero tail.
        p_ref[...] = jnp.zeros_like(p_ref)
        Wp_dst = Wo + 2 * padding
        for y in range(Ho):
            dst = (padding + y) * Wp_dst + padding
            p_ref[:, dst:dst + Wo] = y_full[:, y * Wp_src:y * Wp_src + Wo]

    y1 = conv_stage(x_ref[...], w1_ref, b1_ref, Wp1, L1)   # (Cout, L1) f32
    repad(p2_ref, y1, Wp1, Ho1, Wo1)
    y2 = conv_stage(p2_ref[...], w2_ref, b2_ref, Wp2, L2)  # (Cout, L2) f32
    repad(p3_ref, y2, Wp2, Ho2, Wo2)
    y3 = conv_stage(p3_ref[...], w3_ref, b3_ref, Wp3, L3)  # (Cout, L3) f32
    o_ref[...] = y3.astype(o_ref.dtype)


def _stage_geometry(H, W, *, K, padding, dilation, n_stages=3):
    # stride == 1 geometry of the chained convs (static Python ints).
    geom = []
    h, w = H, W
    for _ in range(n_stages):
        hp, wp = h + 2 * padding, w + 2 * padding
        ho, wo = hp - dilation * (K - 1), wp - dilation * (K - 1)
        L = hp * wp
        Lext = L + dilation * (K - 1) * (wp + 1)   # room for the shifted im2col taps
        geom.append((hp, wp, ho, wo, L, Lext))
        h, w = ho, wo
    return tuple(geom)


def fused_conv3(x_padflat, w1, w2, w3, b1, b2, b3, *, K, padding, dilation, geom):
    B, Cin, Lext1 = x_padflat.shape
    Cout = w1.shape[1]
    Lext2 = geom[1][5]
    L3, Lext3 = geom[2][4], geom[2][5]
    kernel = functools.partial(_fused_conv3_kernel, K=K, padding=padding,
                               dilation=dilation, geom=geom)
    return pl.pallas_call(
        kernel,
        out_shape=jax.ShapeDtypeStruct((B, Cout, L3), jnp.float32),
        grid=(B,),
        in_specs=[
            pl.BlockSpec((None, Cin, Lext1), lambda i: (i, 0, 0)),
            pl.BlockSpec((None, Cout, w1.shape[2]), lambda i: (i, 0, 0)),
            pl.BlockSpec((None, Cout, w2.shape[2]), lambda i: (i, 0, 0)),
            pl.BlockSpec((None, Cout, w3.shape[2]), lambda i: (i, 0, 0)),
            pl.BlockSpec((None, Cout, 1), lambda i: (i, 0, 0)),
            pl.BlockSpec((None, Cout, 1), lambda i: (i, 0, 0)),
            pl.BlockSpec((None, Cout, 1), lambda i: (i, 0, 0)),
        ],
        out_specs=pl.BlockSpec((None, Cout, L3), lambda i: (i, 0, 0)),
        scratch_shapes=[pltpu.VMEM((Cout, Lext2), jnp.float32),
                        pltpu.VMEM((Cout, Lext3), jnp.float32)],
        compiler_params=pltpu.CompilerParams(dimension_semantics=("parallel",)),
    )(x_padflat, w1, w2, w3, b1, b2, b3)


# ----------------------------------------------------------------------------
# Parameter init (deterministic, synthetic — mirrors the __init__ shapes).
# ----------------------------------------------------------------------------
def init_params(key, in_channels, out_channels, kernel_size, E, ratio):
    hidden = in_channels // ratio
    ks = jax.random.split(key, 8)
    ctrl_w1 = jax.random.normal(ks[0], (hidden, in_channels), jnp.float32) * np.sqrt(2.0 / hidden)
    ctrl_w2 = jax.random.normal(ks[1], (E * out_channels, hidden), jnp.float32) * np.sqrt(
        2.0 / (E * out_channels))
    scale = 0.1  # modest scale to keep chained-conv magnitudes reasonable (synthetic init)
    weight1 = jax.random.normal(
        ks[2], (E, out_channels, in_channels, kernel_size, kernel_size), jnp.float32) * scale
    weight2 = jax.random.normal(
        ks[3], (E, out_channels, out_channels, kernel_size, kernel_size), jnp.float32) * scale
    weight3 = jax.random.normal(
        ks[4], (E, out_channels, out_channels, kernel_size, kernel_size), jnp.float32) * scale
    bias1 = jax.random.normal(ks[5], (E, out_channels), jnp.float32) * scale
    bias2 = jax.random.normal(ks[6], (E, out_channels), jnp.float32) * scale
    bias3 = jax.random.normal(ks[7], (E, out_channels), jnp.float32) * scale
    return dict(ctrl_w1=ctrl_w1, ctrl_w2=ctrl_w2,
                weight1=weight1, weight2=weight2, weight3=weight3,
                bias1=bias1, bias2=bias2, bias3=bias3)


# ----------------------------------------------------------------------------
# Forward pass (glue in JAX, fused conv hot path in Pallas).
# ----------------------------------------------------------------------------
def _control_coeff(x_nchw, params, *, E, out_channels, temperature):
    B = x_nchw.shape[0]
    pooled = jnp.mean(x_nchw, axis=(2, 3))                     # AdaptiveAvgPool2d(1): (B, Cin)
    h = jnp.maximum(pooled @ params["ctrl_w1"].T, 0.0)         # 1x1 conv + ReLU
    logits = h @ params["ctrl_w2"].T                           # (B, E*oc); channel = oc*E + e
    coeff = jax.nn.softmax(logits.reshape(B, out_channels, E) / temperature, axis=2)
    return coeff                                               # (B, oc, E)


def assembled_block_forward(x, params, *, kernel_size, stride, padding, dilation,
                            E, temperature, out_channels):
    # TODO(synk): stride > 1 and groups > 1 paths are not implemented (module
    # defaults assumed: groups == 1; the chained convs here use stride == 1).
    if stride != 1:
        raise NotImplementedError("Pallas AssembledBlock kernel supports stride == 1 only")
    B, Cin, H, W = x.shape
    K, p, d = kernel_size, padding, dilation
    coeff = _control_coeff(x, params, E=E, out_channels=out_channels, temperature=temperature)

    # Expert mixing; flatten weights tap-major / input-channel-minor and cast to
    # bf16 so the kernel weight operand is lane-dense and MXU-native.
    def agg_w(w):  # (E, oc, ic, k, k) -> (B, oc, k*k*ic) bf16
        aw = jnp.einsum("boe,eoipq->bopqi", coeff, w)          # (B, oc, K, K, ic)
        return aw.reshape(B, out_channels, -1).astype(jnp.bfloat16)

    def agg_b(bv):  # (E, oc) -> (B, oc, 1) f32
        return jnp.einsum("boe,eo->bo", coeff, bv)[:, :, None]

    w1, w2, w3 = agg_w(params["weight1"]), agg_w(params["weight2"]), agg_w(params["weight3"])
    b1, b2, b3 = agg_b(params["bias1"]), agg_b(params["bias2"]), agg_b(params["bias3"])

    geom = _stage_geometry(H, W, K=K, padding=p, dilation=d)
    L1, Lext1 = geom[0][4], geom[0][5]
    Hp3, Wp3, Ho3, Wo3 = geom[2][0], geom[2][1], geom[2][2], geom[2][3]

    # Pad the original input ONCE, flatten spatial onto lanes, zero-extend the
    # tail so every shifted im2col slice stays in bounds.  (Intermediate stages
    # are padded in-kernel in VMEM; no per-stage jnp.pad / HBM round trip.)
    xp = jnp.pad(x, ((0, 0), (0, 0), (p, p), (p, p))).reshape(B, Cin, L1)
    xp = jnp.pad(xp, ((0, 0), (0, 0), (0, Lext1 - L1)))

    out_flat = fused_conv3(xp, w1, w2, w3, b1, b2, b3,
                           K=K, padding=p, dilation=d, geom=geom)   # (B, oc, L3)
    out = out_flat.reshape(B, out_channels, Hp3, Wp3)[:, :, :Ho3, :Wo3]
    return out                                                      # NCHW


# ----------------------------------------------------------------------------
# Pure-JAX reference (lax.conv, HIGHEST precision) for correctness checking.
# ----------------------------------------------------------------------------
def reference_forward(x, params, *, kernel_size, stride, padding, dilation,
                      E, temperature, out_channels):
    coeff = _control_coeff(x, params, E=E, out_channels=out_channels, temperature=temperature)
    aw = [jnp.einsum("boe,eoipq->boipq", coeff, params[k]) for k in ("weight1", "weight2", "weight3")]
    ab = [jnp.einsum("boe,eo->bo", coeff, params[k]) for k in ("bias1", "bias2", "bias3")]

    def conv(a, w, b):  # a:(B,C,H,W), w:(B,oc,ic,k,k), b:(B,oc)
        def one(a_b, w_b, b_b):
            y = jax.lax.conv_general_dilated(
                a_b[None], w_b, (stride, stride),
                ((padding, padding), (padding, padding)),
                rhs_dilation=(dilation, dilation),
                dimension_numbers=("NCHW", "OIHW", "NCHW"),
                precision=jax.lax.Precision.HIGHEST,
            )[0]
            return y + b_b[:, None, None]
        return jax.vmap(one)(a, w, b)

    a = x
    for w, b in zip(aw, ab):
        a = conv(a, w, b)
    return a


# ----------------------------------------------------------------------------
if __name__ == "__main__":
    B, Cin, Cout, H, W = 2, 8, 8, 16, 16
    K, stride, padding, dilation = 3, 1, 1, 1
    E, temperature, ratio = 4, 30.0, 4

    key = jax.random.PRNGKey(0)
    kx, kp = jax.random.split(key)
    x = jax.random.normal(kx, (B, Cin, H, W), jnp.float32)
    params = init_params(kp, Cin, Cout, K, E, ratio)

    cfg = dict(kernel_size=K, stride=stride, padding=padding, dilation=dilation,
               E=E, temperature=temperature, out_channels=Cout)

    out = assembled_block_forward(x, params, **cfg)
    out = jax.block_until_ready(out)

    ref = reference_forward(x, params, **cfg)
    ref = jax.block_until_ready(ref)

    assert out.shape == (B, Cout, H, W), out.shape
    rel_err = float(jnp.max(jnp.abs(out - ref)) / (jnp.max(jnp.abs(ref)) + 1e-6))
    assert rel_err < 5e-2, f"relative error too large: {rel_err}"

    print("KERNEL_OK")
</pallas_src>

<mosaic_0001>
module attributes {stable_mosaic.version = 11 : i64} {
  func.func @_fused_conv3_kernel(%arg0: i32, %arg1: memref<1x8x362xf32, #tpu.memory_space<vmem>>, %arg2: memref<1x8x72xbf16, #tpu.memory_space<vmem>>, %arg3: memref<1x8x72xbf16, #tpu.memory_space<vmem>>, %arg4: memref<1x8x72xbf16, #tpu.memory_space<vmem>>, %arg5: memref<1x8x1xf32, #tpu.memory_space<vmem>>, %arg6: memref<1x8x1xf32, #tpu.memory_space<vmem>>, %arg7: memref<1x8x1xf32, #tpu.memory_space<vmem>>, %arg8: memref<1x8x324xf32, #tpu.memory_space<vmem>>, %arg9: memref<8x362xf32, #tpu.memory_space<vmem>>, %arg10: memref<8x362xf32, #tpu.memory_space<vmem>>) attributes {dimension_semantics = [#tpu.dimension_semantics<parallel>], iteration_bounds = array<i64: 2>, scalar_prefetch = 0 : i64, scratch_operands = 2 : i64, tpu.core_type = #tpu.core_type<tc>, window_params = [{transform_indices = @transform_0, window_bounds = array<i64: 1, 8, 362>}, {transform_indices = @transform_1, window_bounds = array<i64: 1, 8, 72>}, {transform_indices = @transform_2, window_bounds = array<i64: 1, 8, 72>}, {transform_indices = @transform_3, window_bounds = array<i64: 1, 8, 72>}, {transform_indices = @transform_4, window_bounds = array<i64: 1, 8, 1>}, {transform_indices = @transform_5, window_bounds = array<i64: 1, 8, 1>}, {transform_indices = @transform_6, window_bounds = array<i64: 1, 8, 1>}, {transform_indices = @transform_7, window_bounds = array<i64: 1, 8, 324>}]} {
    %c0 = arith.constant 0 : index
    %c0_0 = arith.constant 0 : index
    %c0_1 = arith.constant 0 : index
    %0 = vector.load %arg1[%c0, %c0_0, %c0_1] : memref<1x8x362xf32, #tpu.memory_space<vmem>>, vector<1x8x362xf32>
    %1 = vector.shape_cast %0 : vector<1x8x362xf32> to vector<8x362xf32>
    %2 = vector.extract_strided_slice %1 {offsets = [0, 0], sizes = [8, 324], strides = [1, 1]} : vector<8x362xf32> to vector<8x324xf32>
    %3 = vector.extract_strided_slice %1 {offsets = [0, 1], sizes = [8, 324], strides = [1, 1]} : vector<8x362xf32> to vector<8x324xf32>
    %4 = vector.extract_strided_slice %1 {offsets = [0, 2], sizes = [8, 324], strides = [1, 1]} : vector<8x362xf32> to vector<8x324xf32>
    %5 = vector.extract_strided_slice %1 {offsets = [0, 18], sizes = [8, 324], strides = [1, 1]} : vector<8x362xf32> to vector<8x324xf32>
    %6 = vector.extract_strided_slice %1 {offsets = [0, 19], sizes = [8, 324], strides = [1, 1]} : vector<8x362xf32> to vector<8x324xf32>
    %7 = vector.extract_strided_slice %1 {offsets = [0, 20], sizes = [8, 324], strides = [1, 1]} : vector<8x362xf32> to vector<8x324xf32>
    %8 = vector.extract_strided_slice %1 {offsets = [0, 36], sizes = [8, 324], strides = [1, 1]} : vector<8x362xf32> to vector<8x324xf32>
    %9 = vector.extract_strided_slice %1 {offsets = [0, 37], sizes = [8, 324], strides = [1, 1]} : vector<8x362xf32> to vector<8x324xf32>
    %10 = vector.extract_strided_slice %1 {offsets = [0, 38], sizes = [8, 324], strides = [1, 1]} : vector<8x362xf32> to vector<8x324xf32>
    %11 = tpu.concatenate %2, %3, %4, %5, %6, %7, %8, %9, %10 in 0 : vector<8x324xf32>, vector<8x324xf32>, vector<8x324xf32>, vector<8x324xf32>, vector<8x324xf32>, vector<8x324xf32>, vector<8x324xf32>, vector<8x324xf32>, vector<8x324xf32> -> vector<72x324xf32>
    %12 = arith.truncf %11 : vector<72x324xf32> to vector<72x324xbf16>
    %c0_2 = arith.constant 0 : index
    %c0_3 = arith.constant 0 : index
    %c0_4 = arith.constant 0 : index
    %13 = vector.load %arg2[%c0_2, %c0_3, %c0_4] : memref<1x8x72xbf16, #tpu.memory_space<vmem>>, vector<1x8x72xbf16>
    %14 = vector.shape_cast %13 : vector<1x8x72xbf16> to vector<8x72xbf16>
    %cst = arith.constant dense<0.000000e+00> : vector<8x324xf32>
    %15 = tpu.matmul %14, %12, %cst {dimension_numbers = #tpu.dot_dimension_numbers<[1], [0], [0], [1], [0, 0, 1, 1], [], []>} : vector<8x72xbf16>, vector<72x324xbf16>, vector<8x324xf32> -> vector<8x324xf32>
    %c0_5 = arith.constant 0 : index
    %c0_6 = arith.constant 0 : index
    %c0_7 = arith.constant 0 : index
    %16 = vector.load %arg5[%c0_5, %c0_6, %c0_7] : memref<1x8x1xf32, #tpu.memory_space<vmem>>, vector<1x8x1xf32>
    %17 = vector.shape_cast %16 : vector<1x8x1xf32> to vector<8x1xf32>
    %18 = vector.broadcast %17 : vector<8x1xf32> to vector<8x324xf32>
    %19 = arith.addf %15, %18 : vector<8x324xf32>
    %cst_8 = arith.constant 0.000000e+00 : f32
    %20 = vector.broadcast %cst_8 : f32 to vector<8x362xf32>
    %c0_9 = arith.constant 0 : index
    %c0_10 = arith.constant 0 : index
    %21 = vector.load %arg9[%c0_9, %c0_10] : memref<8x362xf32, #tpu.memory_space<vmem>>, vector<8x362xf32>
    tpu.vector_store %arg9[%c0_9, %c0_10], %20 {strides = array<i32>} : memref<8x362xf32, #tpu.memory_space<vmem>>, vector<8x362xf32>,
    %22 = vector.extract_strided_slice %19 {offsets = [0, 0], sizes = [8, 16], strides = [1, 1]} : vector<8x324xf32> to vector<8x16xf32>
    %c0_11 = arith.constant 0 : index
    %c19 = arith.constant 19 : index
    %23 = vector.load %arg9[%c0_11, %c19] : memref<8x362xf32, #tpu.memory_space<vmem>>, vector<8x16xf32>
    tpu.vector_store %arg9[%c0_11, %c19], %22 {strides = array<i32>} : memref<8x362xf32, #tpu.memory_space<vmem>>, vector<8x16xf32>,
    %24 = vector.extract_strided_slice %19 {offsets = [0, 18], sizes = [8, 16], strides = [1, 1]} : vector<8x324xf32> to vector<8x16xf32>
    %c0_12 = arith.constant 0 : index
    %c37 = arith.constant 37 : index
    %25 = vector.load %arg9[%c0_12, %c37] : memref<8x362xf32, #tpu.memory_space<vmem>>, vector<8x16xf32>
    tpu.vector_store %arg9[%c0_12, %c37], %24 {strides = array<i32>} : memref<8x362xf32, #tpu.memory_space<vmem>>, vector<8x16xf32>,
    %26 = vector.extract_strided_slice %19 {offsets = [0, 36], sizes = [8, 16], strides = [1, 1]} : vector<8x324xf32> to vector<8x16xf32>
    %c0_13 = arith.constant 0 : index
    %c55 = arith.constant 55 : index
    %27 = vector.load %arg9[%c0_13, %c55] : memref<8x362xf32, #tpu.memory_space<vmem>>, vector<8x16xf32>
    tpu.vector_store %arg9[%c0_13, %c55], %26 {strides = array<i32>} : memref<8x362xf32, #tpu.memory_space<vmem>>, vector<8x16xf32>,
    %28 = vector.extract_strided_slice %19 {offsets = [0, 54], sizes = [8, 16], strides = [1, 1]} : vector<8x324xf32> to vector<8x16xf32>
    %c0_14 = arith.constant 0 : index
    %c73 = arith.constant 73 : index
    %29 = vector.load %arg9[%c0_14, %c73] : memref<8x362xf32, #tpu.memory_space<vmem>>, vector<8x16xf32>
    tpu.vector_store %arg9[%c0_14, %c73], %28 {strides = array<i32>} : memref<8x362xf32, #tpu.memory_space<vmem>>, vector<8x16xf32>,
    %30 = vector.extract_strided_slice %19 {offsets = [0, 72], sizes = [8, 16], strides = [1, 1]} : vector<8x324xf32> to vector<8x16xf32>
    %c0_15 = arith.constant 0 : index
    %c91 = arith.constant 91 : index
    %31 = vector.load %arg9[%c0_15, %c91] : memref<8x362xf32, #tpu.memory_space<vmem>>, vector<8x16xf32>
    tpu.vector_store %arg9[%c0_15, %c91], %30 {strides = array<i32>} : memref<8x362xf32, #tpu.memory_space<vmem>>, vector<8x16xf32>,
    %32 = vector.extract_strided_slice %19 {offsets = [0, 90], sizes = [8, 16], strides = [1, 1]} : vector<8x324xf32> to vector<8x16xf32>
    %c0_16 = arith.constant 0 : index
    %c109 = arith.constant 109 : index
    %33 = vector.load %arg9[%c0_16, %c109] : memref<8x362xf32, #tpu.memory_space<vmem>>, vector<8x16xf32>
    tpu.vector_store %arg9[%c0_16, %c109], %32 {strides = array<i32>} : memref<8x362xf32, #tpu.memory_space<vmem>>, vector<8x16xf32>,
    %34 = vector.extract_strided_slice %19 {offsets = [0, 108], sizes = [8, 16], strides = [1, 1]} : vector<8x324xf32> to vector<8x16xf32>
    %c0_17 = arith.constant 0 : index
    %c127 = arith.constant 127 : index
    %35 = vector.load %arg9[%c0_17, %c127] : memref<8x362xf32, #tpu.memory_space<vmem>>, vector<8x16xf32>
    tpu.vector_store %arg9[%c0_17, %c127], %34 {strides = array<i32>} : memref<8x362xf32, #tpu.memory_space<vmem>>, vector<8x16xf32>,
    %36 = vector.extract_strided_slice %19 {offsets = [0, 126], sizes = [8, 16], strides = [1, 1]} : vector<8x324xf32> to vector<8x16xf32>
    %c0_18 = arith.constant 0 : index
    %c145 = arith.constant 145 : index
    %37 = vector.load %arg9[%c0_18, %c145] : memref<8x362xf32, #tpu.memory_space<vmem>>, vector<8x16xf32>
    tpu.vector_store %arg9[%c0_18, %c145], %36 {strides = array<i32>} : memref<8x362xf32, #tpu.memory_space<vmem>>, vector<8x16xf32>,
    %38 = vector.extract_strided_slice %19 {offsets = [0, 144], sizes = [8, 16], strides = [1, 1]} : vector<8x324xf32> to vector<8x16xf32>
    %c0_19 = arith.constant 0 : index
    %c163 = arith.constant 163 : index
    %39 = vector.load %arg9[%c0_19, %c163] : memref<8x362xf32, #tpu.memory_space<vmem>>, vector<8x16xf32>
    tpu.vector_store %arg9[%c0_19, %c163], %38 {strides = array<i32>} : memref<8x362xf32, #tpu.memory_space<vmem>>, vector<8x16xf32>,
    %40 = vector.extract_strided_slice %19 {offsets = [0, 162], sizes = [8, 16], strides = [1, 1]} : vector<8x324xf32> to vector<8x16xf32>
    %c0_20 = arith.constant 0 : index
    %c181 = arith.constant 181 : index
    %41 = vector.load %arg9[%c0_20, %c181] : memref<8x362xf32, #tpu.memory_space<vmem>>, vector<8x16xf32>
    tpu.vector_store %arg9[%c0_20, %c181], %40 {strides = array<i32>} : memref<8x362xf32, #tpu.memory_space<vmem>>, vector<8x16xf32>,
    %42 = vector.extract_strided_slice %19 {offsets = [0, 180], sizes = [8, 16], strides = [1, 1]} : vector<8x324xf32> to vector<8x16xf32>
    %c0_21 = arith.constant 0 : index
    %c199 = arith.constant 199 : index
    %43 = vector.load %arg9[%c0_21, %c199] : memref<8x362xf32, #tpu.memory_space<vmem>>, vector<8x16xf32>
    tpu.vector_store %arg9[%c0_21, %c199], %42 {strides = array<i32>} : memref<8x362xf32, #tpu.memory_space<vmem>>, vector<8x16xf32>,
    %44 = vector.extract_strided_slice %19 {offsets = [0, 198], sizes = [8, 16], strides = [1, 1]} : vector<8x324xf32> to vector<8x16xf32>
    %c0_22 = arith.constant 0 : index
    %c217 = arith.constant 217 : index
    %45 = vector.load %arg9[%c0_22, %c217] : memref<8x362xf32, #tpu.memory_space<vmem>>, vector<8x16xf32>
    tpu.vector_store %arg9[%c0_22, %c217], %44 {strides = array<i32>} : memref<8x362xf32, #tpu.memory_space<vmem>>, vector<8x16xf32>,
    %46 = vector.extract_strided_slice %19 {offsets = [0, 216], sizes = [8, 16], strides = [1, 1]} : vector<8x324xf32> to vector<8x16xf32>
    %c0_23 = arith.constant 0 : index
    %c235 = arith.constant 235 : index
    %47 = vector.load %arg9[%c0_23, %c235] : memref<8x362xf32, #tpu.memory_space<vmem>>, vector<8x16xf32>
    tpu.vector_store %arg9[%c0_23, %c235], %46 {strides = array<i32>} : memref<8x362xf32, #tpu.memory_space<vmem>>, vector<8x16xf32>,
    %48 = vector.extract_strided_slice %19 {offsets = [0, 234], sizes = [8, 16], strides = [1, 1]} : vector<8x324xf32> to vector<8x16xf32>
    %c0_24 = arith.constant 0 : index
    %c253 = arith.constant 253 : index
    %49 = vector.load %arg9[%c0_24, %c253] : memref<8x362xf32, #tpu.memory_space<vmem>>, vector<8x16xf32>
    tpu.vector_store %arg9[%c0_24, %c253], %48 {strides = array<i32>} : memref<8x362xf32, #tpu.memory_space<vmem>>, vector<8x16xf32>,
    %50 = vector.extract_strided_slice %19 {offsets = [0, 252], sizes = [8, 16], strides = [1, 1]} : vector<8x324xf32> to vector<8x16xf32>
    %c0_25 = arith.constant 0 : index
    %c271 = arith.constant 271 : index
    %51 = vector.load %arg9[%c0_25, %c271] : memref<8x362xf32, #tpu.memory_space<vmem>>, vector<8x16xf32>
    tpu.vector_store %arg9[%c0_25, %c271], %50 {strides = array<i32>} : memref<8x362xf32, #tpu.memory_space<vmem>>, vector<8x16xf32>,
    %52 = vector.extract_strided_slice %19 {offsets = [0, 270], sizes = [8, 16], strides = [1, 1]} : vector<8x324xf32> to vector<8x16xf32>
    %c0_26 = arith.constant 0 : index
    %c289 = arith.constant 289 : index
    %53 = vector.load %arg9[%c0_26, %c289] : memref<8x362xf32, #tpu.memory_space<vmem>>, vector<8x16xf32>
    tpu.vector_store %arg9[%c0_26, %c289], %52 {strides = array<i32>} : memref<8x362xf32, #tpu.memory_space<vmem>>, vector<8x16xf32>,
    %c0_27 = arith.constant 0 : index
    %c0_28 = arith.constant 0 : index
    %54 = vector.load %arg9[%c0_27, %c0_28] : memref<8x362xf32, #tpu.memory_space<vmem>>, vector<8x362xf32>
    %55 = vector.extract_strided_slice %54 {offsets = [0, 0], sizes = [8, 324], strides = [1, 1]} : vector<8x362xf32> to vector<8x324xf32>
    %56 = vector.extract_strided_slice %54 {offsets = [0, 1], sizes = [8, 324], strides = [1, 1]} : vector<8x362xf32> to vector<8x324xf32>
    %57 = vector.extract_strided_slice %54 {offsets = [0, 2], sizes = [8, 324], strides = [1, 1]} : vector<8x362xf32> to vector<8x324xf32>
    %58 = vector.extract_strided_slice %54 {offsets = [0, 18], sizes = [8, 324], strides = [1, 1]} : vector<8x362xf32> to vector<8x324xf32>
    %59 = vector.extract_strided_slice %54 {offsets = [0, 19], sizes = [8, 324], strides = [1, 1]} : vector<8x362xf32> to vector<8x324xf32>
    %60 = vector.extract_strided_slice %54 {offsets = [0, 20], sizes = [8, 324], strides = [1, 1]} : vector<8x362xf32> to vector<8x324xf32>
    %61 = vector.extract_strided_slice %54 {offsets = [0, 36], sizes = [8, 324], strides = [1, 1]} : vector<8x362xf32> to vector<8x324xf32>
    %62 = vector.extract_strided_slice %54 {offsets = [0, 37], sizes = [8, 324], strides = [1, 1]} : vector<8x362xf32> to vector<8x324xf32>
    %63 = vector.extract_strided_slice %54 {offsets = [0, 38], sizes = [8, 324], strides = [1, 1]} : vector<8x362xf32> to vector<8x324xf32>
    %64 = tpu.concatenate %55, %56, %57, %58, %59, %60, %61, %62, %63 in 0 : vector<8x324xf32>, vector<8x324xf32>, vector<8x324xf32>, vector<8x324xf32>, vector<8x324xf32>, vector<8x324xf32>, vector<8x324xf32>, vector<8x324xf32>, vector<8x324xf32> -> vector<72x324xf32>
    %65 = arith.truncf %64 : vector<72x324xf32> to vector<72x324xbf16>
    %c0_29 = arith.constant 0 : index
    %c0_30 = arith.constant 0 : index
    %c0_31 = arith.constant 0 : index
    %66 = vector.load %arg3[%c0_29, %c0_30, %c0_31] : memref<1x8x72xbf16, #tpu.memory_space<vmem>>, vector<1x8x72xbf16>
    %67 = vector.shape_cast %66 : vector<1x8x72xbf16> to vector<8x72xbf16>
    %cst_32 = arith.constant dense<0.000000e+00> : vector<8x324xf32>
    %68 = tpu.matmul %67, %65, %cst_32 {dimension_numbers = #tpu.dot_dimension_numbers<[1], [0], [0], [1], [0, 0, 1, 1], [], []>} : vector<8x72xbf16>, vector<72x324xbf16>, vector<8x324xf32> -> vector<8x324xf32>
    %c0_33 = arith.constant 0 : index
    %c0_34 = arith.constant 0 : index
    %c0_35 = arith.constant 0 : index
    %69 = vector.load %arg6[%c0_33, %c0_34, %c0_35] : memref<1x8x1xf32, #tpu.memory_space<vmem>>, vector<1x8x1xf32>
    %70 = vector.shape_cast %69 : vector<1x8x1xf32> to vector<8x1xf32>
    %71 = vector.broadcast %70 : vector<8x1xf32> to vector<8x324xf32>
    %72 = arith.addf %68, %71 : vector<8x324xf32>
    %cst_36 = arith.constant 0.000000e+00 : f32
    %73 = vector.broadcast %cst_36 : f32 to vector<8x362xf32>
    %c0_37 = arith.constant 0 : index
    %c0_38 = arith.constant 0 : index
    %74 = vector.load %arg10[%c0_37, %c0_38] : memref<8x362xf32, #tpu.memory_space<vmem>>, vector<8x362xf32>
    tpu.vector_store %arg10[%c0_37, %c0_38], %73 {strides = array<i32>} : memref<8x362xf32, #tpu.memory_space<vmem>>, vector<8x362xf32>,
    %75 = vector.extract_strided_slice %72 {offsets = [0, 0], sizes = [8, 16], strides = [1, 1]} : vector<8x324xf32> to vector<8x16xf32>
    %c0_39 = arith.constant 0 : index
    %c19_40 = arith.constant 19 : index
    %76 = vector.load %arg10[%c0_39, %c19_40] : memref<8x362xf32, #tpu.memory_space<vmem>>, vector<8x16xf32>
    tpu.vector_store %arg10[%c0_39, %c19_40], %75 {strides = array<i32>} : memref<8x362xf32, #tpu.memory_space<vmem>>, vector<8x16xf32>,
    %77 = vector.extract_strided_slice %72 {offsets = [0, 18], sizes = [8, 16], strides = [1, 1]} : vector<8x324xf32> to vector<8x16xf32>
    %c0_41 = arith.constant 0 : index
    %c37_42 = arith.constant 37 : index
    %78 = vector.load %arg10[%c0_41, %c37_42] : memref<8x362xf32, #tpu.memory_space<vmem>>, vector<8x16xf32>
    tpu.vector_store %arg10[%c0_41, %c37_42], %77 {strides = array<i32>} : memref<8x362xf32, #tpu.memory_space<vmem>>, vector<8x16xf32>,
    %79 = vector.extract_strided_slice %72 {offsets = [0, 36], sizes = [8, 16], strides = [1, 1]} : vector<8x324xf32> to vector<8x16xf32>
    %c0_43 = arith.constant 0 : index
    %c55_44 = arith.constant 55 : index
    %80 = vector.load %arg10[%c0_43, %c55_44] : memref<8x362xf32, #tpu.memory_space<vmem>>, vector<8x16xf32>
    tpu.vector_store %arg10[%c0_43, %c55_44], %79 {strides = array<i32>} : memref<8x362xf32, #tpu.memory_space<vmem>>, vector<8x16xf32>,
    %81 = vector.extract_strided_slice %72 {offsets = [0, 54], sizes = [8, 16], strides = [1, 1]} : vector<8x324xf32> to vector<8x16xf32>
    %c0_45 = arith.constant 0 : index
    %c73_46 = arith.constant 73 : index
    %82 = vector.load %arg10[%c0_45, %c73_46] : memref<8x362xf32, #tpu.memory_space<vmem>>, vector<8x16xf32>
    tpu.vector_store %arg10[%c0_45, %c73_46], %81 {strides = array<i32>} : memref<8x362xf32, #tpu.memory_space<vmem>>, vector<8x16xf32>,
    %83 = vector.extract_strided_slice %72 {offsets = [0, 72], sizes = [8, 16], strides = [1, 1]} : vector<8x324xf32> to vector<8x16xf32>
    %c0_47 = arith.constant 0 : index
    %c91_48 = arith.constant 91 : index
    %84 = vector.load %arg10[%c0_47, %c91_48] : memref<8x362xf32, #tpu.memory_space<vmem>>, vector<8x16xf32>
    tpu.vector_store %arg10[%c0_47, %c91_48], %83 {strides = array<i32>} : memref<8x362xf32, #tpu.memory_space<vmem>>, vector<8x16xf32>,
    %85 = vector.extract_strided_slice %72 {offsets = [0, 90], sizes = [8, 16], strides = [1, 1]} : vector<8x324xf32> to vector<8x16xf32>
    %c0_49 = arith.constant 0 : index
    %c109_50 = arith.constant 109 : index
    %86 = vector.load %arg10[%c0_49, %c109_50] : memref<8x362xf32, #tpu.memory_space<vmem>>, vector<8x16xf32>
    tpu.vector_store %arg10[%c0_49, %c109_50], %85 {strides = array<i32>} : memref<8x362xf32, #tpu.memory_space<vmem>>, vector<8x16xf32>,
    %87 = vector.extract_strided_slice %72 {offsets = [0, 108], sizes = [8, 16], strides = [1, 1]} : vector<8x324xf32> to vector<8x16xf32>
    %c0_51 = arith.constant 0 : index
    %c127_52 = arith.constant 127 : index
    %88 = vector.load %arg10[%c0_51, %c127_52] : memref<8x362xf32, #tpu.memory_space<vmem>>, vector<8x16xf32>
    tpu.vector_store %arg10[%c0_51, %c127_52], %87 {strides = array<i32>} : memref<8x362xf32, #tpu.memory_space<vmem>>, vector<8x16xf32>,
    %89 = vector.extract_strided_slice %72 {offsets = [0, 126], sizes = [8, 16], strides = [1, 1]} : vector<8x324xf32> to vector<8x16xf32>
    %c0_53 = arith.constant 0 : index
    %c145_54 = arith.constant 145 : index
    %90 = vector.load %arg10[%c0_53, %c145_54] : memref<8x362xf32, #tpu.memory_space<vmem>>, vector<8x16xf32>
    tpu.vector_store %arg10[%c0_53, %c145_54], %89 {strides = array<i32>} : memref<8x362xf32, #tpu.memory_space<vmem>>, vector<8x16xf32>,
    %91 = vector.extract_strided_slice %72 {offsets = [0, 144], sizes = [8, 16], strides = [1, 1]} : vector<8x324xf32> to vector<8x16xf32>
    %c0_55 = arith.constant 0 : index
    %c163_56 = arith.constant 163 : index
    %92 = vector.load %arg10[%c0_55, %c163_56] : memref<8x362xf32, #tpu.memory_space<vmem>>, vector<8x16xf32>
    tpu.vector_store %arg10[%c0_55, %c163_56], %91 {strides = array<i32>} : memref<8x362xf32, #tpu.memory_space<vmem>>, vector<8x16xf32>,
    %93 = vector.extract_strided_slice %72 {offsets = [0, 162], sizes = [8, 16], strides = [1, 1]} : vector<8x324xf32> to vector<8x16xf32>
    %c0_57 = arith.constant 0 : index
    %c181_58 = arith.constant 181 : index
    %94 = vector.load %arg10[%c0_57, %c181_58] : memref<8x362xf32, #tpu.memory_space<vmem>>, vector<8x16xf32>
    tpu.vector_store %arg10[%c0_57, %c181_58], %93 {strides = array<i32>} : memref<8x362xf32, #tpu.memory_space<vmem>>, vector<8x16xf32>,
    %95 = vector.extract_strided_slice %72 {offsets = [0, 180], sizes = [8, 16], strides = [1, 1]} : vector<8x324xf32> to vector<8x16xf32>
    %c0_59 = arith.constant 0 : index
    %c199_60 = arith.constant 199 : index
    %96 = vector.load %arg10[%c0_59, %c199_60] : memref<8x362xf32, #tpu.memory_space<vmem>>, vector<8x16xf32>
    tpu.vector_store %arg10[%c0_59, %c199_60], %95 {strides = array<i32>} : memref<8x362xf32, #tpu.memory_space<vmem>>, vector<8x16xf32>,
    %97 = vector.extract_strided_slice %72 {offsets = [0, 198], sizes = [8, 16], strides = [1, 1]} : vector<8x324xf32> to vector<8x16xf32>
    %c0_61 = arith.constant 0 : index
    %c217_62 = arith.constant 217 : index
    %98 = vector.load %arg10[%c0_61, %c217_62] : memref<8x362xf32, #tpu.memory_space<vmem>>, vector<8x16xf32>
    tpu.vector_store %arg10[%c0_61, %c217_62], %97 {strides = array<i32>} : memref<8x362xf32, #tpu.memory_space<vmem>>, vector<8x16xf32>,
    %99 = vector.extract_strided_slice %72 {offsets = [0, 216], sizes = [8, 16], strides = [1, 1]} : vector<8x324xf32> to vector<8x16xf32>
    %c0_63 = arith.constant 0 : index
    %c235_64 = arith.constant 235 : index
    %100 = vector.load %arg10[%c0_63, %c235_64] : memref<8x362xf32, #tpu.memory_space<vmem>>, vector<8x16xf32>
    tpu.vector_store %arg10[%c0_63, %c235_64], %99 {strides = array<i32>} : memref<8x362xf32, #tpu.memory_space<vmem>>, vector<8x16xf32>,
    %101 = vector.extract_strided_slice %72 {offsets = [0, 234], sizes = [8, 16], strides = [1, 1]} : vector<8x324xf32> to vector<8x16xf32>
    %c0_65 = arith.constant 0 : index
    %c253_66 = arith.constant 253 : index
    %102 = vector.load %arg10[%c0_65, %c253_66] : memref<8x362xf32, #tpu.memory_space<vmem>>, vector<8x16xf32>
    tpu.vector_store %arg10[%c0_65, %c253_66], %101 {strides = array<i32>} : memref<8x362xf32, #tpu.memory_space<vmem>>, vector<8x16xf32>,
    %103 = vector.extract_strided_slice %72 {offsets = [0, 252], sizes = [8, 16], strides = [1, 1]} : vector<8x324xf32> to vector<8x16xf32>
    %c0_67 = arith.constant 0 : index
    %c271_68 = arith.constant 271 : index
    %104 = vector.load %arg10[%c0_67, %c271_68] : memref<8x362xf32, #tpu.memory_space<vmem>>, vector<8x16xf32>
    tpu.vector_store %arg10[%c0_67, %c271_68], %103 {strides = array<i32>} : memref<8x362xf32, #tpu.memory_space<vmem>>, vector<8x16xf32>,
    %105 = vector.extract_strided_slice %72 {offsets = [0, 270], sizes = [8, 16], strides = [1, 1]} : vector<8x324xf32> to vector<8x16xf32>
    %c0_69 = arith.constant 0 : index
    %c289_70 = arith.constant 289 : index
    %106 = vector.load %arg10[%c0_69, %c289_70] : memref<8x362xf32, #tpu.memory_space<vmem>>, vector<8x16xf32>
    tpu.vector_store %arg10[%c0_69, %c289_70], %105 {strides = array<i32>} : memref<8x362xf32, #tpu.memory_space<vmem>>, vector<8x16xf32>,
    %c0_71 = arith.constant 0 : index
    %c0_72 = arith.constant 0 : index
    %107 = vector.load %arg10[%c0_71, %c0_72] : memref<8x362xf32, #tpu.memory_space<vmem>>, vector<8x362xf32>
    %108 = vector.extract_strided_slice %107 {offsets = [0, 0], sizes = [8, 324], strides = [1, 1]} : vector<8x362xf32> to vector<8x324xf32>
    %109 = vector.extract_strided_slice %107 {offsets = [0, 1], sizes = [8, 324], strides = [1, 1]} : vector<8x362xf32> to vector<8x324xf32>
    %110 = vector.extract_strided_slice %107 {offsets = [0, 2], sizes = [8, 324], strides = [1, 1]} : vector<8x362xf32> to vector<8x324xf32>
    %111 = vector.extract_strided_slice %107 {offsets = [0, 18], sizes = [8, 324], strides = [1, 1]} : vector<8x362xf32> to vector<8x324xf32>
    %112 = vector.extract_strided_slice %107 {offsets = [0, 19], sizes = [8, 324], strides = [1, 1]} : vector<8x362xf32> to vector<8x324xf32>
    %113 = vector.extract_strided_slice %107 {offsets = [0, 20], sizes = [8, 324], strides = [1, 1]} : vector<8x362xf32> to vector<8x324xf32>
    %114 = vector.extract_strided_slice %107 {offsets = [0, 36], sizes = [8, 324], strides = [1, 1]} : vector<8x362xf32> to vector<8x324xf32>
    %115 = vector.extract_strided_slice %107 {offsets = [0, 37], sizes = [8, 324], strides = [1, 1]} : vector<8x362xf32> to vector<8x324xf32>
    %116 = vector.extract_strided_slice %107 {offsets = [0, 38], sizes = [8, 324], strides = [1, 1]} : vector<8x362xf32> to vector<8x324xf32>
    %117 = tpu.concatenate %108, %109, %110, %111, %112, %113, %114, %115, %116 in 0 : vector<8x324xf32>, vector<8x324xf32>, vector<8x324xf32>, vector<8x324xf32>, vector<8x324xf32>, vector<8x324xf32>, vector<8x324xf32>, vector<8x324xf32>, vector<8x324xf32> -> vector<72x324xf32>
    %118 = arith.truncf %117 : vector<72x324xf32> to vector<72x324xbf16>
    %c0_73 = arith.constant 0 : index
    %c0_74 = arith.constant 0 : index
    %c0_75 = arith.constant 0 : index
    %119 = vector.load %arg4[%c0_73, %c0_74, %c0_75] : memref<1x8x72xbf16, #tpu.memory_space<vmem>>, vector<1x8x72xbf16>
    %120 = vector.shape_cast %119 : vector<1x8x72xbf16> to vector<8x72xbf16>
    %cst_76 = arith.constant dense<0.000000e+00> : vector<8x324xf32>
    %121 = tpu.matmul %120, %118, %cst_76 {dimension_numbers = #tpu.dot_dimension_numbers<[1], [0], [0], [1], [0, 0, 1, 1], [], []>} : vector<8x72xbf16>, vector<72x324xbf16>, vector<8x324xf32> -> vector<8x324xf32>
    %c0_77 = arith.constant 0 : index
    %c0_78 = arith.constant 0 : index
    %c0_79 = arith.constant 0 : index
    %122 = vector.load %arg7[%c0_77, %c0_78, %c0_79] : memref<1x8x1xf32, #tpu.memory_space<vmem>>, vector<1x8x1xf32>
    %123 = vector.shape_cast %122 : vector<1x8x1xf32> to vector<8x1xf32>
    %124 = vector.broadcast %123 : vector<8x1xf32> to vector<8x324xf32>
    %125 = arith.addf %121, %124 : vector<8x324xf32>
    %c0_80 = arith.constant 0 : index
    %c0_81 = arith.constant 0 : index
    %c0_82 = arith.constant 0 : index
    %126 = vector.load %arg8[%c0_80, %c0_81, %c0_82] : memref<1x8x324xf32, #tpu.memory_space<vmem>>, vector<1x8x324xf32>
    %127 = vector.shape_cast %126 : vector<1x8x324xf32> to vector<8x324xf32>
    %128 = vector.shape_cast %125 : vector<8x324xf32> to vector<1x8x324xf32>
    tpu.vector_store %arg8[%c0_80, %c0_81, %c0_82], %128 {strides = array<i32>} : memref<1x8x324xf32, #tpu.memory_space<vmem>>, vector<1x8x324xf32>,
    return
  }
  func.func @transform_0(%arg0: i32) -> (i32, i32, i32) {
    %c0_i32 = arith.constant 0 : i32
    %c0_i32_0 = arith.constant 0 : i32
    %c0_i32_1 = arith.constant 0 : i32
    return %arg0, %c0_i32, %c0_i32_0 : i32, i32, i32
  }
  func.func @transform_1(%arg0: i32) -> (i32, i32, i32) {
    %c0_i32 = arith.constant 0 : i32
    %c0_i32_0 = arith.constant 0 : i32
    %c0_i32_1 = arith.constant 0 : i32
    return %arg0, %c0_i32, %c0_i32_0 : i32, i32, i32
  }
  func.func @transform_2(%arg0: i32) -> (i32, i32, i32) {
    %c0_i32 = arith.constant 0 : i32
    %c0_i32_0 = arith.constant 0 : i32
    %c0_i32_1 = arith.constant 0 : i32
    return %arg0, %c0_i32, %c0_i32_0 : i32, i32, i32
  }
  func.func @transform_3(%arg0: i32) -> (i32, i32, i32) {
    %c0_i32 = arith.constant 0 : i32
    %c0_i32_0 = arith.constant 0 : i32
    %c0_i32_1 = arith.constant 0 : i32
    return %arg0, %c0_i32, %c0_i32_0 : i32, i32, i32
  }
  func.func @transform_4(%arg0: i32) -> (i32, i32, i32) {
    %c0_i32 = arith.constant 0 : i32
    %c0_i32_0 = arith.constant 0 : i32
    %c0_i32_1 = arith.constant 0 : i32
    return %arg0, %c0_i32, %c0_i32_0 : i32, i32, i32
  }
  func.func @transform_5(%arg0: i32) -> (i32, i32, i32) {
    %c0_i32 = arith.constant 0 : i32
    %c0_i32_0 = arith.constant 0 : i32
    %c0_i32_1 = arith.constant 0 : i32
    return %arg0, %c0_i32, %c0_i32_0 : i32, i32, i32
  }
  func.func @transform_6(%arg0: i32) -> (i32, i32, i32) {
    %c0_i32 = arith.constant 0 : i32
    %c0_i32_0 = arith.constant 0 : i32
    %c0_i32_1 = arith.constant 0 : i32
    return %arg0, %c0_i32, %c0_i32_0 : i32, i32, i32
  }
  func.func @transform_7(%arg0: i32) -> (i32, i32, i32) {
    %c0_i32 = arith.constant 0 : i32
    %c0_i32_0 = arith.constant 0 : i32
    %c0_i32_1 = arith.constant 0 : i32
    return %arg0, %c0_i32, %c0_i32_0 : i32, i32, i32
  }
}

</mosaic_0001>

<bundles_post_ra>
// kernel: tpu_custom_call.1
= control target key start
LH: loop header
LB: loop body
LE: loop exit
PB: predicated region body
PF: predicated region fallthrough
CT: control target
= control target key end

     0   :  { %s2100_s0 = inlined_call_operand.vmem [shape: f32[2,8,362], index: 0, kind: input, shape index: {}]   ;;  %s2101_s1 = inlined_call_operand.vmem [shape: bf16[2,8,72], index: 1, kind: input, shape index: {}]   ;;  %s2102_s2 = inlined_call_operand.hbm [shape: bf16[2,8,72], index: 2, kind: input, shape index: {}]   ;;  %s2103_s3 = inlined_call_operand.vmem [shape: bf16[2,8,72], index: 3, kind: input, shape index: {}]   ;;  %s2104_s4 = inlined_call_operand.vmem [shape: f32[2,8,1], index: 4, kind: input, shape index: {}]   ;;  %s2105_s5 = inlined_call_operand.vmem [shape: f32[2,8,1], index: 5, kind: input, shape index: {}]   ;;  %s2106_s6 = inlined_call_operand.vmem [shape: f32[2,8,1], index: 6, kind: input, shape index: {}]   ;;  %s2107_s7 = inlined_call_operand.hbm [shape: f32[2,8,324], index: 7, kind: output, shape index: {}]  }
   0x1   :  { %2136 = sst [smem:[#allocation10_spill]] %s2100_s0 }
   0x2   :  { %12 = vsyncpa [#allocation5], 0 }
   0x3   :  { %14 = vsyncpa [#allocation5 + $0x1], 0 }
   0x4   :  { %15 = vsyncpa [#allocation6], 0 }
   0x5   :  { %17 = vsyncpa [#allocation6 + $0x1], 0  ;;  %s1712_s24 = smov 0   ;;  %s1714_s25 = smov 0  }
   0x6   :  { %s1716_s26 = smov 0   ;;  %s1718_s27 = smov 0  }
   0x7 LB: > { %s1733_s28 = sadd.s32 4294967295, %s1656_s27   ;;  %s1292_s29 = sadd.s32 4294967294, %s1656_s27   ;;  %s1656_s27 = sphi %s1718_s27, %s2203_s27   ;;  %s1652_s26 = sphi %s1716_s26, %s2202_s26   ;;  %s1648_s25 = sphi %s1714_s25, %s2201_s25   ;;  %s1644_s24 = sphi %s1712_s24, %s2200_s24  }
   0x8   : > { %s1737_s30 = sadd.s32 1, %s1656_s27   ;;  %s82_s8 = sadd.s32 1, %s1652_s26 }
   0x9   : > { %s79_s9 = ssub.s32 %s1656_s27, %s1737_s30  ;;  %p89_p0 = scmp.ne.s32.totalorder %s1652_s26, %s1648_s25 }
   0xa   : > { %p80_p1 = scmp.eq.s32.totalorder %s79_s9, 0  ;;  %p90_p2 = scmp.eq.s32.totalorder %s1656_s27, 0 }
   0xb   : > { %p95_p3 = scmp.ne.s32.totalorder %s1648_s25, %s1644_s24  ;;  %p96_p4 = scmp.eq.s32.totalorder %s1733_s28, 0 }
   0xc   : > { %s1749_s10 = scalar_select %p80_p1, %s1652_s26, %s82_s8  }
   0xd   : > { %p1751_p5 = por %p90_p2, %p89_p0  ;;  %p1755_p6 = por %p96_p4, %p95_p3 }
   0xe   : > { %p223_p7 = scmp.eq.s32.totalorder %s1733_s28, 1  ;;  %p229_p8 = scmp.eq.s32.totalorder %s1292_s29, 1 }
   0xf   : > { %p1392_p10 = scmp.lt.s32.totalorder %s1656_s27, 2  ;;  %s264_s15 = sand.u32 1, %s1652_s26  }
  0x10   : > { %p1762_p11 = por %p223_p7, %p89_p0  ;;  %p1766_p12 = por %p229_p8, %p95_p3 }
  0x11   : > { %s1296_s16 = sshll.u32 %s1656_s27, 6  ;;  %s1295_s17 = sshll.u32 %s264_s15, 2 }
  0x12   : > { %s2139_s13 = scalar_select %p1762_p11, 1, 0 }
  0x13   : > { %s2140_s14 = scalar_select %p1766_p12, 1, 0 }
  0x14   : > { %s1775_s20 = scalar_lea.hbm %s2102_s2, %s1296_s16  ;;  %s268_s21 = scalar_lea.vmem [#allocation4], %s1295_s17 }
  0x15   : > { %s275_s22 = sshll.u32 %s268_s21, 4  ;;  %p1779_p13 = pnand %p1392_p10, %p1751_p5  ;;  %s1783_s22 = int_to_ptr.vmem [resolvable:$true] %s275_s22 }
  0x16   : > { %s265_s29 = scalar_lea.sflag [#allocation5], %s264_s15  ;;  %s1560_s8 = scalar_lea.hbm %s1775_s20, 64 }
  0x17   : > { %p1561_p2 = scmp.ne.s32.totalorder %s1775_s20, %s1560_s8  ;;  %p1562_p3 = pneg %p1779_p13 }
  0x18   : > { %s1565_s16 = scalar_lea.hbm %s2102_s2, 128  ;;  %p1566_p5 = scmp.lt.u32.totalorder %s1775_s20, %s2102_s2 }
  0x19   : > { %p1563_p4 = pnand %p1562_p3, %p1561_p2  ;;  %p1567_p8 = scmp.lt.u32.totalorder %s1565_s16, %s1560_s8 }
  0x1a   : > { %p1569_p9 = scmp.lt.u32.totalorder %s1560_s8, %s1775_s20 }
  0x1b   : > { %p1564_p7 = pneg %p1563_p4  ;;  %p1568_p10 = por %p1567_p8, %p1566_p5 }
  0x1d   : > { %p1570_p0 = por %p1569_p9, %p1568_p10 }
  0x1f   : > { %p1571_p1 = pnand %p1570_p0, %p1564_p7 }
  0x21   : > { %1574 = shalt.err (!%p1571_p1)
}
  0x22   : > { %s1575_s15 = scalar_lea.vmem %s1783_s22, 64  ;;  %s1658_s19 = smov [#allocation4]  }
  0x23   : > { %p1576_p2 = scmp.ne.s32.totalorder %s1783_s22, %s1575_s15  ;;  %s1580_s21 = sshll.u32 %s1658_s19, 4  ;;  %s1581_s21 = int_to_ptr.vmem [resolvable:$false] %s1580_s21 }
  0x24   : > { %s1582_s9 = scalar_lea.vmem %s1581_s21, 128  ;;  %p1583_p11 = scmp.lt.s32.totalorder %s1783_s22, %s1581_s21 }
  0x25   : > { %p1578_p4 = pnand %p1576_p2, %p1562_p3  ;;  %p1584_p5 = scmp.lt.s32.totalorder %s1582_s9, %s1575_s15 }
  0x27   : > { %p1579_p12 = pneg %p1578_p4  ;;  %p1585_p8 = por %p1584_p5, %p1583_p11 }
  0x29   : > { %p1586_p9 = pnand %p1585_p8, %p1579_p12 }
  0x2b   : > { %1589 = shalt.err (!%p1586_p9)
}
  0x2c   : > { %1387 = dma.hbm_to_vmem [thread:$0]  (!%p1779_p13), %s1775_s20, 64, %s1783_s22, %s265_s29  }
  0x2d   : > { %p2142_p0 = scmp.lt.s32.totalorder %s1656_s27, 3  ;;  %p2143_p1 = scmp.ge.s32.totalorder %s1656_s27, 1 }
  0x2f   : > { %p309_p3 = pnand %p2143_p1, %p2142_p0 }
  0x30   : > { %s1817_s8 = sand.u32 (!%p309_p3), 1, %s1648_s25  }
  0x31   : > { %312 = sbr.rel (%p309_p3) target bundleno = 1453 (0x5ad), region = 48  ;;  %s1298_s11 = sshll.u32 (!%p309_p3), %s1817_s8, 2 }
  0x32   : > { %s315_s16 = scalar_lea.sflag (!%p309_p3), [#allocation5], %s1817_s8  ;;  %s1821_s17 = scalar_lea.vmem (!%p309_p3), [#allocation4], %s1298_s11 }
  0x38   : > { %1635 = dma.done.wait (%p1755_p6), %s315_s16, 64  }
  0x39   : > { %1637 = vsyncadd (%p1755_p6), %s315_s16, 4294967232  ;;  %p374_p11 = scmp.lt.s32.totalorder %s1733_s28, 1  ;;  %v1659_v0 = vmov 0.0   ;;  %s2144_s0 = sld [smem:[#allocation10_spill]]  ;;  %v1667_v5 = vmov 0   ;;  %vm2113_vm0 = vmmov 0  }
  0x3a   : > { %1335 = vmatprep.subr.bf16.mxu1 %v1659_v0  ;;  %619 = vst [vmem:[#allocation2] sm:$0xff] %v1659_v0  ;;  %620 = vst [vmem:[#allocation2 + $0x8] sm:$0xff] %v1659_v0  ;;  %s1660_s18 = smov 126   ;;  %s1661_s15 = smov 127   ;;  %570 = vmatprep.mubr.bf16.mxu0 %v1667_v5  ;;  %vm2132_vm1 = vcmask 1039360   ;;  %vm2134_vm2 = vcmask 900096  }
  0x3b   : > { %885 = vst [vmem:[#allocation3] sm:$0xff] %v1659_v0  ;;  %886 = vst [vmem:[#allocation3 + $0x8] sm:$0xff] %v1659_v0  ;;  %s1834_s20 = scalar_select %p374_p11, %s1733_s28, 1  ;;  %1345 = vmatprep.mubr.msk.bf16.mxu1 %vm2113_vm0, %v1659_v0  ;;  %1478 = vset.pattern.permute.xlu0 %v1667_v5  ;;  %vm2121_vm3 = vcmask 1031168   ;;  %vm2120_vm4 = vcmask 883712   ;;  %vm2119_vm5 = vcmask 891904  }
  0x3c   : > { %s1662_s19 = smov 110   ;;  %s2109_s21 = smov 108   ;;  %1519 = vset.pattern.permute.xlu1 %v1667_v5  ;;  %vm2118_vm6 = vcmask 744448   ;;  %vm2117_vm7 = vcmask 752640   ;;  %vm2116_vm8 = vcmask 736256   ;;  %vm2115_vm9 = vcmask 1043456  }
  0x3d   : > { %s1378_s22 = smul.u32 24, %s1834_s20  ;;  %s1664_s9 = smov 109   ;;  %vm2114_vm10 = vcmask 588800   ;;  %vm621_vm11 = vcmask 867328   ;;  %vm627_vm12 = vcmask 285848   ;;  %vm2122_vm13 = vcmask 121856  }
  0x3e   : > { %s1665_s11 = smov 91   ;;  %s1666_s16 = smov 92   ;;  %622 = vst.msk [vmem:[#allocation2 + $0x10] sm:$0xff] %vm621_vm11, %v1659_v0  ;;  %887 = vst.msk [vmem:[#allocation3 + $0x10] sm:$0xff] %vm621_vm11, %v1659_v0  ;;  %vm629_vm14 = vcmask 433448   ;;  %vm2123_vm15 = vcmask 581048  }
  0x3f   : > { %s378_s29 = scalar_lea.vmem %s2144_s0, %s1378_s22  ;;  %s1860_s22 = sshll.u32 %s1834_s20, 3  ;;  %vm2124_vm11 = vcmask 728648  }
  0x40   : > { %v401_v1 = vld [vmem:[%s378_s29 + $0x8] sm:$0xff]  ;;  %v402_v2 = vld [vmem:[%s378_s29 + $0x10] sm:$0xff]  ;;  %v400_v4 = vld [vmem:[%s378_s29] sm:$0xff]  ;;  %s390_s29 = scalar_lea.vmem %s2104_s4, %s1860_s22  ;;  %s2127_s12 = sshll.u32 %s1834_s20, 2 }
  0x41   : > { %v1443_v3 = vpack.i.bf16 %v402_v2, %v401_v1  ;;  %v1473_v6 = vpack.i.bf16 %v401_v1, %v400_v4  ;;  %v518_v7 = vld [vmem:[%s390_s29] sm:$0xff]  ;;  %s2145_s23 = smov 108   ;;  %s2146_s0 = smov 90  }
  0x42   : > { %s398_s29 = scalar_lea.vmem %s2106_s6, %s1860_s22  ;;  %p2197_p12 = scmp.ne.s32.totalorder %s2139_s13, 0 }
  0x43   : > { %1444 = vrot.lane.b32.xlu1 %v1443_v3, %s1660_s18  ;;  %1439 = vrot.lane.b32.xlu0 %v1443_v3, %s1661_s15 }
  0x47   : > { %1449 = vrot.lane.b32.xlu1 %v1443_v3, %s1662_s19  ;;  %406 = vrot.lane.b32.xlu0 %v400_v4, %s1661_s15 }
  0x4b   : > { %430 = vrot.lane.b32.xlu1 %v400_v4, %s1662_s19  ;;  %418 = vrot.lane.b32.xlu0 %v400_v4, %s1660_s18 }
  0x4f   : > { %1459 = vrot.lane.b32.xlu1 %v1443_v3, %s2109_s21  ;;  %1454 = vrot.lane.b32.xlu0 %v1443_v3, %s1664_s9 }
  0x53   : > { %454 = vrot.lane.b32.xlu1 %v400_v4, %s2109_s21  ;;  %442 = vrot.lane.b32.xlu0 %v400_v4, %s1664_s9  ;;  %s2111_s21 = smov 90  }
  0x57   : > { %1469 = vrot.lane.b32.xlu1 %v1443_v3, %s1665_s11  ;;  %1464 = vrot.lane.b32.xlu0 %v1443_v3, %s1666_s16 }
  0x5b   : > { %478 = vrot.lane.b32.xlu1 %v400_v4, %s1665_s11  ;;  %466 = vrot.lane.b32.xlu0 %v400_v4, %s1666_s16 }
  0x5f   : > { %1474 = vrot.lane.b32.xlu0 %v1473_v6, %s2111_s21  ;;  %494 = vrot.lane.b32.xlu1 %v402_v2, %s2111_s21  ;;  %s382_s21 = scalar_lea.vmem %s2101_s1, %s2127_s12 }
  0x63   : > { %521 = vperm.xlu0 %1478, %v518_v7  }
  0xb5   : > { %v1445_v8 = vpop.permute.xlu1 %1444  ;;  %v1440_v9 = vpop.permute.xlu0 %1439 }
  0xb6   : > { %v1442_v10 = vunpack.i.h.bf16 %v1440_v9  ;;  %v1441_v11 = vunpack.i.l.bf16 %v1440_v9  ;;  %v1447_v12 = vunpack.i.h.bf16 %v1445_v8  ;;  %v1446_v13 = vunpack.i.l.bf16 %v1445_v8 }
  0xb8   : > { %v504_v14 = vpack.c.bf16 %v1442_v10, %v402_v2  ;;  %v414_v15 = vsel %vm2132_vm1, %v1441_v11, %v1442_v10  ;;  %v426_v24 = vsel %vm2121_vm3, %v1446_v13, %v1447_v12  ;;  %v517_v10 = vld [vmem:[%s382_s21] sm:$0xf]  ;;  %s2128_s21 = smov 19  }
  0xb9   : > { %v1450_v16 = vpop.permute.xlu1 %1449  ;;  %v407_v17 = vpop.permute.xlu0 %406  ;;  %v503_v18 = vpack.c.bf16 %v414_v15, %v401_v1 }
  0xba   : > { %v1452_v19 = vunpack.i.h.bf16 %v1450_v16  ;;  %v1451_v20 = vunpack.i.l.bf16 %v1450_v16  ;;  %v413_v21 = vsel %vm2132_vm1, %v407_v17, %v1441_v11  ;;  %1336 = vmatpush3.bf16.msra.mxu1 %v504_v14 }
  0xbb   : > { %538 = vmatprep.subr.bf16.mxu0 %v503_v18  ;;  %1337 = vmatprep.subr.bf16.mxu1 %v1659_v0  ;;  %v502_v22 = vpack.c.bf16 %v413_v21, %v400_v4 }
  0xbc   : > { %v507_v23 = vpack.c.bf16 %v1452_v19, %v1447_v12  ;;  %v438_v25 = vsel %vm2134_vm2, %v1451_v20, %v1452_v19 }
  0xbd   : > { %v431_v26 = vpop.permute.xlu1 %430  ;;  %539 = vmatpush1.bf16.msra.mxu0 %v502_v22  ;;  %v419_v27 = vpop.permute.xlu0 %418  ;;  %v506_v28 = vpack.c.bf16 %v438_v25, %v426_v24 }
  0xbe   : > { %v437_v29 = vsel %vm2134_vm2, %v431_v26, %v1451_v20  ;;  %v425_v30 = vsel %vm2121_vm3, %v419_v27, %v1446_v13  ;;  %1338 = vmatpush3.bf16.msra.mxu1 %v507_v23  ;;  %vm2133_vm3 = vcmask 400648  }
  0xbf   : > { %v505_v31 = vpack.c.bf16 %v437_v29, %v425_v30  ;;  %540 = vmatprep.subr.bf16.mxu0 %v506_v28  ;;  %1339 = vmatprep.subr.bf16.mxu1 %v1659_v0 }
  0xc1   : > { %v1460_v32 = vpop.permute.xlu1 %1459  ;;  %541 = vmatpush1.bf16.msra.mxu0 %v505_v31  ;;  %v1455_v33 = vpop.permute.xlu0 %1454 }
  0xc2   : > { %v1462_v34 = vunpack.i.h.bf16 %v1460_v32  ;;  %v1461_v35 = vunpack.i.l.bf16 %v1460_v32  ;;  %v1457_v36 = vunpack.i.h.bf16 %v1455_v33  ;;  %v1456_v37 = vunpack.i.l.bf16 %v1455_v33 }
  0xc4   : > { %v510_v38 = vpack.c.bf16 %v1462_v34, %v1457_v36  ;;  %v450_v39 = vsel %vm2119_vm5, %v1456_v37, %v1457_v36  ;;  %v462_v40 = vsel %vm2120_vm4, %v1461_v35, %v1462_v34 }
  0xc5   : > { %v455_v41 = vpop.permute.xlu1 %454  ;;  %v443_v42 = vpop.permute.xlu0 %442  ;;  %v509_v43 = vpack.c.bf16 %v462_v40, %v450_v39 }
  0xc6   : > { %v461_v44 = vsel %vm2120_vm4, %v455_v41, %v1461_v35  ;;  %v449_v45 = vsel %vm2119_vm5, %v443_v42, %v1456_v37  ;;  %1340 = vmatpush3.bf16.msra.mxu1 %v510_v38  ;;  %vm639_vm5 = vcmask 1048568   ;;  %vm652_vm4 = vcmask 417048  }
  0xc7   : > { %v508_v46 = vpack.c.bf16 %v461_v44, %v449_v45  ;;  %542 = vmatprep.subr.bf16.mxu0 %v509_v43  ;;  %1341 = vmatprep.subr.bf16.mxu1 %v1659_v0 }
  0xc9   : > { %v1470_v47 = vpop.permute.xlu1 %1469  ;;  %v1465_v48 = vpop.permute.xlu0 %1464  ;;  %543 = vmatpush1.bf16.msra.mxu0 %v508_v46 }
  0xca   : > { %v1472_v49 = vunpack.i.h.bf16 %v1470_v47  ;;  %v1471_v50 = vunpack.i.l.bf16 %v1470_v47  ;;  %v1467_v51 = vunpack.i.h.bf16 %v1465_v48  ;;  %v1466_v52 = vunpack.i.l.bf16 %v1465_v48 }
  0xcc   : > { %v513_v53 = vpack.c.bf16 %v1472_v49, %v1467_v51  ;;  %v474_v54 = vsel %vm2117_vm7, %v1466_v52, %v1467_v51  ;;  %v486_v55 = vsel %vm2118_vm6, %v1471_v50, %v1472_v49 }
  0xcd   : > { %v479_v56 = vpop.permute.xlu1 %478  ;;  %v467_v57 = vpop.permute.xlu0 %466  ;;  %v512_v58 = vpack.c.bf16 %v486_v55, %v474_v54 }
  0xce   : > { %v485_v59 = vsel %vm2118_vm6, %v479_v56, %v1471_v50  ;;  %v473_v60 = vsel %vm2117_vm7, %v467_v57, %v1466_v52  ;;  %1342 = vmatpush3.bf16.msra.mxu1 %v513_v53  ;;  %vm649_vm7 = vcmask 269448   ;;  %vm671_vm6 = vcmask 253048  }
  0xcf   : > { %v511_v61 = vpack.c.bf16 %v485_v59, %v473_v60  ;;  %544 = vmatprep.subr.bf16.mxu0 %v512_v58  ;;  %1343 = vmatprep.subr.bf16.mxu1 %v1659_v0 }
  0xd1   : > { %v1475_v62 = vpop.permute.xlu0 %1474  ;;  %545 = vmatpush1.bf16.msra.mxu0 %v511_v61  ;;  %v495_v63 = vpop.permute.xlu1 %494 }
  0xd2   : > { %v1477_v1 = vunpack.i.h.bf16 %v1475_v62  ;;  %v1476_v2 = vunpack.i.l.bf16 %v1475_v62  ;;  %v516_v3 = vpack.c.bf16 %v495_v63, %v495_v63 }
  0xd4   : > { %v498_v4 = vsel %vm2116_vm8, %v1477_v1, %v495_v63  ;;  %v536_v6 = vsel %vm2115_vm9, %v516_v3, 0  ;;  %v497_v7 = vsel %vm2116_vm8, %v1476_v2, %v1477_v1  ;;  %vm637_vm8 = vcmask 1023848  }
  0xd5   : > { %v515_v8 = vpack.c.bf16 %v498_v4, %v498_v4  ;;  %1344 = vmatpush3.bf16.msra.mxu1 %v536_v6  ;;  %v514_v9 = vpack.c.bf16 %v497_v7, %v497_v7 }
  0xd6   : > { %1349 = vmatprep.subr.bf16.mxu1 %v1659_v0 }
  0xd7   : > { %1305 = vmatprep.subr.msk.bf16.mxu0 %vm2115_vm9, %v515_v8  ;;  %v530_v11 = vsel %vm2115_vm9, %v514_v9, 0  ;;  %vm2126_vm9 = vcmask 105472  }
  0xd8   : > { %547 = vmatpush1.bf16.msra.mxu0 %v530_v11  ;;  %1346 = vmatmul.mubr.msk.bf16.vlgmr.msra.gmra.mrb[0].mxu1 %vm2114_vm10, %v517_v10 }
  0xd9   : > { %1359 = vmatprep.mubr.msk.bf16.mxu1 %vm2113_vm0, %v1659_v0  ;;  %vm2125_vm0 = vcmask 876248  }
  0xdb   : > { %1306 = vmatmul.mubr.msk.bf16.vlgmr.msra.gmra.mrb[0].mxu0 %vm2114_vm10, %v517_v10  ;;  %vm646_vm10 = vcmask 154624  }
  0xdc   : > { %836 = vmatprep.mubr.bf16.mxu0 %v1667_v5 }
  0xe2   : > { %v522_v12 = vpop.permute.xlu0 %521 }
 0x1ab   : > { %v613_v13 = vpop.f32.mrb[0].mxu1 }
 0x1ac   : > { %v614_v14 = vadd.f32 %v613_v13, %v522_v12  ;;  %v1347_v15 = vpop.f32.mrb[1].mxu1 }
 0x1ad   : > { %v616_v16 = vpop.f32.mrb[2].mxu1 }
 0x1ae   : > { %v572_v17 = vpop.f32.mrb[0].mxu0  ;;  %667 = vrot.lane.b32.xlu0 %v614_v14, %s2128_s21  ;;  %v1348_v18 = vpop.f32.mrb[3].mxu1 }
 0x1af   : > { %v573_v19 = vadd.f32 %v572_v17, %v522_v12  ;;  %v574_v20 = vpop.f32.mrb[1].mxu0 }
 0x1b0   : > { %v576_v21 = vpop.f32.mrb[2].mxu0  ;;  %v575_v23 = vadd.f32 %v574_v20, %v522_v12 }
 0x1b1   : > { %v577_v22 = vpop.f32.mrb[3].mxu0  ;;  %624 = vrot.lane.b32.xlu1 %v573_v19, %s2128_s21 }
 0x1b5   : > { %644 = vrot.lane.b32.xlu1 %v575_v23, %s2128_s21  ;;  %s394_s21 = scalar_lea.vmem %s2105_s5, %s1860_s22 }
 0x1b6   : > { %v786_v34 = vld [vmem:[%s394_s21] sm:$0xff]  ;;  %s1671_s21 = smov [#allocation7]  }
 0x220   : > { %v668_v25 = vpop.permute.xlu0 %667 }
 0x223   : > { %v625_v24 = vpop.permute.xlu1 %624 }
 0x224   : > { %628 = vst.msk [vmem:[#allocation2] sm:$0xff] %vm627_vm12, %v625_v24 }
 0x225   : > { %642 = vst.msk [vmem:[#allocation2 + $0x8] sm:$0xff] %vm2122_vm13, %v625_v24  ;;  %vm654_vm13 = vcmask 564648  }
 0x226   : > { %630 = vst.msk [vmem:[#allocation2] sm:$0xff] %vm629_vm14, %v625_v24 }
 0x227   : > { %632 = vst.msk [vmem:[#allocation2] sm:$0xff] %vm2123_vm15, %v625_v24  ;;  %v645_v26 = vpop.permute.xlu1 %644  ;;  %vm656_vm15 = vcmask 712248  }
 0x228   : > { %634 = vst.msk [vmem:[#allocation2] sm:$0xff] %vm2124_vm11, %v625_v24  ;;  %v647_v27 = vsel %vm646_vm10, %v625_v24, %v645_v26  ;;  %v669_v28 = vsel %vm646_vm10, %v645_v26, %v668_v25  ;;  %vm2135_vm11 = vcmask 859848  }
 0x229   : > { %636 = vst.msk [vmem:[#allocation2] sm:$0xff] %vm2125_vm0, %v625_v24  ;;  %vm2131_vm0 = vcmask 1007448  }
 0x22a   : > { %665 = vst.msk [vmem:[#allocation2 + $0x10] sm:$0xff] %vm2126_vm9, %v645_v26  ;;  %vm2130_vm9 = vcmask 1048552  }
 0x22b   : > { %638 = vst.msk [vmem:[#allocation2] sm:$0xff] %vm637_vm8, %v625_v24 }
 0x22c   : > { %650 = vst.msk [vmem:[#allocation2 + $0x8] sm:$0xff] %vm649_vm7, %v647_v27 }
 0x22d   : > { %672 = vst.msk [vmem:[#allocation2 + $0x10] sm:$0xff] %vm671_vm6, %v669_v28 }
 0x22e   : > { %640 = vst.msk [vmem:[#allocation2] sm:$0xff] %vm639_vm5, %v625_v24 }
 0x22f   : > { %653 = vst.msk [vmem:[#allocation2 + $0x8] sm:$0xff] %vm652_vm4, %v645_v26 }
 0x230   : > { %675 = vst.msk [vmem:[#allocation2 + $0x10] sm:$0xff] %vm2133_vm3, %v668_v25 }
 0x231   : > { %655 = vst.msk [vmem:[#allocation2 + $0x8] sm:$0xff] %vm654_vm13, %v645_v26 }
 0x232   : > { %657 = vst.msk [vmem:[#allocation2 + $0x8] sm:$0xff] %vm656_vm15, %v645_v26 }
 0x233   : > { %659 = vst.msk [vmem:[#allocation2 + $0x8] sm:$0xff] %vm2135_vm11, %v645_v26  ;;  %vm2162_vm11 = vcmask 588800  }
 0x234   : > { %661 = vst.msk [vmem:[#allocation2 + $0x8] sm:$0xff] %vm2131_vm0, %v645_v26 }
 0x235   : > { %663 = vst.msk [vmem:[#allocation2 + $0x8] sm:$0xff] %vm2130_vm9, %v645_v26  ;;  %v676_v29 = vld [vmem:[#allocation2] sm:$0xff]  ;;  %vm2147_vm9 = vcmask 1031168  }
 0x236   : > { %693 = vrot.lane.b32.xlu1 %v676_v29, %s1660_s18  ;;  %682 = vrot.lane.b32.xlu0 %v676_v29, %s1661_s15  ;;  %vm2148_vm0 = vmmov %vm2147_vm9 }
 0x237   : > { %v678_v31 = vld [vmem:[#allocation2 + $0x10] sm:$0xff] }
 0x23a   : > { %715 = vrot.lane.b32.xlu1 %v676_v29, %s1664_s9  ;;  %704 = vrot.lane.b32.xlu0 %v676_v29, %s1662_s19 }
 0x23c   : > { %v677_v30 = vld [vmem:[#allocation2 + $0x8] sm:$0xff] }
 0x23d   : > { %v1479_v32 = vpack.i.bf16 %v678_v31, %v677_v30  ;;  %v1514_v33 = vpack.i.bf16 %v677_v30, %v676_v29 }
 0x23e   : > { %737 = vrot.lane.b32.xlu1 %v676_v29, %s1666_s16  ;;  %726 = vrot.lane.b32.xlu0 %v676_v29, %s2145_s23 }
 0x242   : > { %748 = vrot.lane.b32.xlu0 %v676_v29, %s1665_s11  ;;  %1480 = vrot.lane.b32.xlu1 %v1479_v32, %s1661_s15 }
 0x246   : > { %1490 = vrot.lane.b32.xlu0 %v1479_v32, %s1662_s19  ;;  %1485 = vrot.lane.b32.xlu1 %v1479_v32, %s1660_s18 }
 0x24a   : > { %1500 = vrot.lane.b32.xlu0 %v1479_v32, %s2145_s23  ;;  %1495 = vrot.lane.b32.xlu1 %v1479_v32, %s1664_s9 }
 0x24e   : > { %1510 = vrot.lane.b32.xlu0 %v1479_v32, %s1665_s11  ;;  %1505 = vrot.lane.b32.xlu1 %v1479_v32, %s1666_s16 }
 0x252   : > { %763 = vrot.lane.b32.xlu0 %v678_v31, %s2146_s0  ;;  %1515 = vrot.lane.b32.xlu1 %v1514_v33, %s2146_s0 }
 0x256   : > { %789 = vperm.xlu1 %1519, %v786_v34  }
 0x2a8   : > { %v683_v35 = vpop.permute.xlu0 %682  ;;  %v694_v36 = vpop.permute.xlu1 %693 }
 0x2ac   : > { %v705_v37 = vpop.permute.xlu0 %704  ;;  %v716_v38 = vpop.permute.xlu1 %715 }
 0x2b0   : > { %v727_v39 = vpop.permute.xlu0 %726  ;;  %v738_v40 = vpop.permute.xlu1 %737 }
 0x2b4   : > { %v749_v41 = vpop.permute.xlu0 %748  ;;  %v1481_v42 = vpop.permute.xlu1 %1480 }
 0x2b5   : > { %v1483_v43 = vunpack.i.h.bf16 %v1481_v42  ;;  %v1482_v44 = vunpack.i.l.bf16 %v1481_v42 }
 0x2b7   : > { %v772_v45 = vpack.c.bf16 %v1483_v43, %v678_v31  ;;  %v688_v46 = vsel %vm2132_vm1, %v683_v35, %v1482_v44  ;;  %v689_v47 = vsel %vm2132_vm1, %v1482_v44, %v1483_v43  ;;  %vm2149_vm1 = vcmask 883712  }
 0x2b8   : > { %v770_v48 = vpack.c.bf16 %v688_v46, %v676_v29  ;;  %v1491_v49 = vpop.permute.xlu0 %1490  ;;  %v1486_v50 = vpop.permute.xlu1 %1485  ;;  %v771_v51 = vpack.c.bf16 %v689_v47, %v677_v30 }
 0x2b9   : > { %v1493_v52 = vunpack.i.h.bf16 %v1491_v49  ;;  %v1492_v53 = vunpack.i.l.bf16 %v1491_v49  ;;  %v1488_v54 = vunpack.i.h.bf16 %v1486_v50  ;;  %v1487_v55 = vunpack.i.l.bf16 %v1486_v50  ;;  %1350 = vmatpush3.bf16.msra.mxu1 %v772_v45 }
 0x2ba   : > { %804 = vmatprep.subr.bf16.mxu0 %v771_v51  ;;  %1351 = vmatprep.subr.bf16.mxu1 %v1659_v0 }
 0x2bb   : > { %v710_v56 = vsel %vm2134_vm2, %v705_v37, %v1492_v53  ;;  %v775_v57 = vpack.c.bf16 %v1493_v52, %v1488_v54  ;;  %v699_v58 = vsel %vm2147_vm9, %v694_v36, %v1487_v55  ;;  %805 = vmatpush1.bf16.msra.mxu0 %v770_v48  ;;  %v700_v59 = vsel %vm2148_vm0, %v1487_v55, %v1488_v54  ;;  %vm2152_vm0 = vmmov %vm2149_vm1  ;;  %v785_v37 = vld [vmem:[%s1821_s17] sm:$0xf]  ;;  %s2165_s17 = smov 19  }
 0x2bc   : > { %v773_v60 = vpack.c.bf16 %v710_v56, %v699_v58  ;;  %v1501_v61 = vpop.permute.xlu0 %1500  ;;  %v1496_v62 = vpop.permute.xlu1 %1495  ;;  %v711_v63 = vsel %vm2134_vm2, %v1492_v53, %v1493_v52  ;;  %vm2150_vm9 = vcmask 891904  }
 0x2bd   : > { %v1503_v1 = vunpack.i.h.bf16 %v1501_v61  ;;  %v1502_v2 = vunpack.i.l.bf16 %v1501_v61  ;;  %v1498_v3 = vunpack.i.h.bf16 %v1496_v62  ;;  %v1497_v4 = vunpack.i.l.bf16 %v1496_v62  ;;  %1352 = vmatpush3.bf16.msra.mxu1 %v775_v57  ;;  %vm2151_vm3 = vmmov %vm2150_vm9 }
 0x2be   : > { %v774_v6 = vpack.c.bf16 %v711_v63, %v700_v59  ;;  %1353 = vmatprep.subr.bf16.mxu1 %v1659_v0 }
 0x2bf   : > { %v732_v7 = vsel %vm2149_vm1, %v727_v39, %v1502_v2  ;;  %v778_v8 = vpack.c.bf16 %v1503_v1, %v1498_v3  ;;  %v721_v9 = vsel %vm2150_vm9, %v716_v38, %v1497_v4  ;;  %v722_v10 = vsel %vm2151_vm3, %v1497_v4, %v1498_v3 }
 0x2c0   : > { %v776_v11 = vpack.c.bf16 %v732_v7, %v721_v9  ;;  %806 = vmatprep.subr.bf16.mxu0 %v774_v6  ;;  %v1511_v12 = vpop.permute.xlu0 %1510  ;;  %v1506_v13 = vpop.permute.xlu1 %1505  ;;  %v733_v14 = vsel %vm2152_vm0, %v1502_v2, %v1503_v1  ;;  %vm2153_vm1 = vcmask 744448   ;;  %vm2154_vm9 = vcmask 752640  }
 0x2c1   : > { %807 = vmatpush1.bf16.msra.mxu0 %v773_v60  ;;  %v1513_v15 = vunpack.i.h.bf16 %v1511_v12  ;;  %v1512_v16 = vunpack.i.l.bf16 %v1511_v12  ;;  %v1508_v17 = vunpack.i.h.bf16 %v1506_v13  ;;  %v1507_v18 = vunpack.i.l.bf16 %v1506_v13  ;;  %1354 = vmatpush3.bf16.msra.mxu1 %v778_v8  ;;  %vm2155_vm3 = vmmov %vm2154_vm9  ;;  %v1032_v60 = vld [vmem:[%s398_s29] sm:$0xff]  ;;  %s1594_s29 = sshll.u32 %s1671_s21, 4  ;;  %s1595_s29 = int_to_ptr.vmem [resolvable:$false] %s1594_s29 }
 0x2c2   : > { %v777_v19 = vpack.c.bf16 %v733_v14, %v722_v10  ;;  %1355 = vmatprep.subr.bf16.mxu1 %v1659_v0  ;;  %vm2156_vm0 = vmmov %vm2153_vm1 }
 0x2c3   : > { %v754_v20 = vsel %vm2153_vm1, %v749_v41, %v1512_v16  ;;  %v781_v21 = vpack.c.bf16 %v1513_v15, %v1508_v17  ;;  %v743_v22 = vsel %vm2154_vm9, %v738_v40, %v1507_v18  ;;  %v744_v23 = vsel %vm2155_vm3, %v1507_v18, %v1508_v17 }
 0x2c4   : > { %v779_v24 = vpack.c.bf16 %v754_v20, %v743_v22  ;;  %808 = vmatprep.subr.bf16.mxu0 %v777_v19  ;;  %v764_v25 = vpop.permute.xlu0 %763  ;;  %v1516_v26 = vpop.permute.xlu1 %1515  ;;  %v755_v27 = vsel %vm2156_vm0, %v1512_v16, %v1513_v15  ;;  %vm2157_vm1 = vcmask 736256   ;;  %vm2158_vm9 = vcmask 1043456  }
 0x2c5   : > { %809 = vmatpush1.bf16.msra.mxu0 %v776_v11  ;;  %v784_v28 = vpack.c.bf16 %v764_v25, %v764_v25  ;;  %v1518_v29 = vunpack.i.h.bf16 %v1516_v26  ;;  %v1517_v30 = vunpack.i.l.bf16 %v1516_v26  ;;  %1356 = vmatpush3.bf16.msra.mxu1 %v781_v21  ;;  %v780_v31 = vpack.c.bf16 %v755_v27, %v744_v23  ;;  %vm2159_vm3 = vmmov %vm2157_vm1 }
 0x2c6   : > { %1357 = vmatprep.subr.bf16.mxu1 %v1659_v0  ;;  %vm2160_vm0 = vmmov %vm2158_vm9 }
 0x2c7   : > { %v766_v32 = vsel %vm2157_vm1, %v1518_v29, %v764_v25  ;;  %810 = vmatprep.subr.bf16.mxu0 %v780_v31  ;;  %v802_v33 = vsel %vm2158_vm9, %v784_v28, 0  ;;  %v765_v34 = vsel %vm2159_vm3, %v1517_v30, %v1518_v29  ;;  %vm2161_vm2 = vmmov %vm2160_vm0  ;;  %vm2163_vm1 = vmmov 0  }
 0x2c8   : > { %v783_v35 = vpack.c.bf16 %v766_v32, %v766_v32  ;;  %v782_v36 = vpack.c.bf16 %v765_v34, %v765_v34  ;;  %vm2164_vm9 = vmmov %vm2162_vm11  ;;  %vm2168_vm3 = vcmask 581048  }
 0x2c9   : > { %811 = vmatpush1.bf16.msra.mxu0 %v779_v24  ;;  %1358 = vmatpush3.bf16.msra.mxu1 %v802_v33 }
 0x2ca   : > { %1308 = vmatprep.subr.msk.bf16.mxu0 %vm2160_vm0, %v783_v35  ;;  %v796_v38 = vsel %vm2161_vm2, %v782_v36, 0  ;;  %1363 = vmatprep.subr.bf16.mxu1 %v1659_v0  ;;  %vm2166_vm2 = vcmask 121856   ;;  %vm2169_vm0 = vcmask 728648  }
 0x2cc   : > { %1360 = vmatmul.mubr.msk.bf16.vlgmr.msra.gmra.mrb[4].mxu1 %vm2162_vm11, %v785_v37  ;;  %vm2167_vm11 = vcmask 105472  }
 0x2cd   : > { %813 = vmatpush1.bf16.msra.mxu0 %v796_v38  ;;  %1373 = vmatprep.mubr.msk.bf16.mxu1 %vm2163_vm1, %v1659_v0  ;;  %vm2170_vm1 = vcmask 876248  }
 0x2d0   : > { %1309 = vmatmul.mubr.msk.bf16.vlgmr.msra.gmra.mrb[4].mxu0 %vm2164_vm9, %v785_v37  ;;  %vm2181_vm9 = vcmask 891904  }
 0x2d1   : > { %1082 = vmatprep.mubr.bf16.mxu0 %v1667_v5 }
 0x2d5   : > { %v790_v41 = vpop.permute.xlu1 %789 }
 0x39f   : > { %v879_v39 = vpop.f32.mrb[4].mxu1 }
 0x3a0   : > { %v1361_v40 = vpop.f32.mrb[5].mxu1  ;;  %v880_v50 = vadd.f32 %v879_v39, %v790_v41 }
 0x3a1   : > { %v882_v42 = vpop.f32.mrb[6].mxu1 }
 0x3a2   : > { %v1362_v43 = vpop.f32.mrb[7].mxu1 }
 0x3a3   : > { %v838_v44 = vpop.f32.mrb[4].mxu0 }
 0x3a4   : > { %v839_v45 = vadd.f32 %v838_v44, %v790_v41  ;;  %v840_v46 = vpop.f32.mrb[5].mxu0 }
 0x3a5   : > { %v841_v47 = vadd.f32 %v840_v46, %v790_v41  ;;  %v842_v48 = vpop.f32.mrb[6].mxu0 }
 0x3a6   : > { %v843_v49 = vpop.f32.mrb[7].mxu0  ;;  %889 = vrot.lane.b32.xlu0 %v839_v45, %s2165_s17 }
 0x3a7   : > { %901 = vrot.lane.b32.xlu1 %v841_v47, %s2165_s17 }
 0x3aa   : > { %915 = vrot.lane.b32.xlu0 %v880_v50, %s2165_s17 }
 0x418   : > { %v890_v51 = vpop.permute.xlu0 %889 }
 0x419   : > { %892 = vst.msk [vmem:[#allocation3] sm:$0xff] %vm627_vm12, %v890_v51  ;;  %v902_v5 = vpop.permute.xlu1 %901  ;;  %vm2172_vm12 = vcmask 400648  }
 0x41a   : > { %899 = vst.msk [vmem:[#allocation3 + $0x8] sm:$0xff] %vm2166_vm2, %v890_v51  ;;  %v903_v52 = vsel %vm646_vm10, %v890_v51, %v902_v5  ;;  %vm2182_vm2 = vcmask 883712  }
 0x41b   : > { %893 = vst.msk [vmem:[#allocation3] sm:$0xff] %vm629_vm14, %v890_v51  ;;  %vm2174_vm14 = vcmask 1048552  }
 0x41c   : > { %913 = vst.msk [vmem:[#allocation3 + $0x10] sm:$0xff] %vm2167_vm11, %v902_v5  ;;  %v916_v53 = vpop.permute.xlu0 %915  ;;  %vm2183_vm11 = vmmov %vm2181_vm9 }
 0x41d   : > { %894 = vst.msk [vmem:[#allocation3] sm:$0xff] %vm2168_vm3, %v890_v51  ;;  %v917_v54 = vsel %vm646_vm10, %v902_v5, %v916_v53  ;;  %vm2178_vm10 = vcmask 900096   ;;  %vm2184_vm3 = vmmov %vm2182_vm2 }
 0x41e   : > { %905 = vst.msk [vmem:[#allocation3 + $0x8] sm:$0xff] %vm649_vm7, %v903_v52  ;;  %vm2171_vm7 = vcmask 859848  }
 0x41f   : > { %895 = vst.msk [vmem:[#allocation3] sm:$0xff] %vm2169_vm0, %v890_v51  ;;  %vm2185_vm0 = vcmask 752640  }
 0x420   : > { %907 = vst.msk [vmem:[#allocation3 + $0x8] sm:$0xff] %vm652_vm4, %v902_v5  ;;  %vm2173_vm4 = vcmask 1007448  }
 0x421   : > { %896 = vst.msk [vmem:[#allocation3] sm:$0xff] %vm2170_vm1, %v890_v51  ;;  %vm2186_vm1 = vcmask 744448  }
 0x422   : > { %908 = vst.msk [vmem:[#allocation3 + $0x8] sm:$0xff] %vm654_vm13, %v902_v5 }
 0x423   : > { %897 = vst.msk [vmem:[#allocation3] sm:$0xff] %vm637_vm8, %v890_v51  ;;  %vm2177_vm8 = vcmask 1031168  }
 0x424   : > { %909 = vst.msk [vmem:[#allocation3 + $0x8] sm:$0xff] %vm656_vm15, %v902_v5  ;;  %vm2179_vm13 = vmmov %vm2177_vm8 }
 0x425   : > { %919 = vst.msk [vmem:[#allocation3 + $0x10] sm:$0xff] %vm671_vm6, %v917_v54  ;;  %vm2180_vm15 = vmmov %vm2178_vm10 }
 0x426   : > { %898 = vst.msk [vmem:[#allocation3] sm:$0xff] %vm639_vm5, %v890_v51  ;;  %vm2175_vm5 = vcmask 1039360  }
 0x427   : > { %910 = vst.msk [vmem:[#allocation3 + $0x8] sm:$0xff] %vm2171_vm7, %v902_v5  ;;  %vm2176_vm6 = vmmov %vm2175_vm5 }
 0x428   : > { %921 = vst.msk [vmem:[#allocation3 + $0x10] sm:$0xff] %vm2172_vm12, %v916_v53  ;;  %vm2187_vm7 = vmmov %vm2185_vm0 }
 0x429   : > { %911 = vst.msk [vmem:[#allocation3 + $0x8] sm:$0xff] %vm2173_vm4, %v902_v5  ;;  %vm2188_vm12 = vmmov %vm2186_vm1  ;;  %vm2190_vm4 = vcmask 736256  }
 0x42a   : > { %912 = vst.msk [vmem:[#allocation3 + $0x8] sm:$0xff] %vm2174_vm14, %v902_v5  ;;  %vm2191_vm14 = vcmask 1043456  }
 0x42d   : > { %v922_v55 = vld [vmem:[#allocation3] sm:$0xff] }
 0x42e   : > { %939 = vrot.lane.b32.xlu1 %v922_v55, %s1660_s18  ;;  %928 = vrot.lane.b32.xlu0 %v922_v55, %s1661_s15 }
 0x42f   : > { %v924_v57 = vld [vmem:[#allocation3 + $0x10] sm:$0xff] }
 0x431   : > { %v923_v56 = vld [vmem:[#allocation3 + $0x8] sm:$0xff] }
 0x432   : > { %961 = vrot.lane.b32.xlu1 %v922_v55, %s1664_s9  ;;  %950 = vrot.lane.b32.xlu0 %v922_v55, %s1662_s19  ;;  %v1520_v58 = vpack.i.bf16 %v924_v57, %v923_v56  ;;  %v1555_v59 = vpack.i.bf16 %v923_v56, %v922_v55 }
 0x436   : > { %983 = vrot.lane.b32.xlu1 %v922_v55, %s1666_s16  ;;  %972 = vrot.lane.b32.xlu0 %v922_v55, %s2145_s23 }
 0x43a   : > { %994 = vrot.lane.b32.xlu0 %v922_v55, %s1665_s11  ;;  %1521 = vrot.lane.b32.xlu1 %v1520_v58, %s1661_s15 }
 0x43e   : > { %1531 = vrot.lane.b32.xlu0 %v1520_v58, %s1662_s19  ;;  %1526 = vrot.lane.b32.xlu1 %v1520_v58, %s1660_s18 }
 0x442   : > { %1541 = vrot.lane.b32.xlu0 %v1520_v58, %s2145_s23  ;;  %1536 = vrot.lane.b32.xlu1 %v1520_v58, %s1664_s9  ;;  %s1379_s9 = smul.u32 384, %s1733_s28  ;;  %s1136_s28 = scalar_lea.sflag [#allocation6], %s1817_s8 }
 0x444   : > { %s2056_s17 = scalar_lea.hbm %s2107_s7, %s1379_s9 }
 0x446   : > { %1551 = vrot.lane.b32.xlu0 %v1520_v58, %s1665_s11  ;;  %1546 = vrot.lane.b32.xlu1 %v1520_v58, %s1666_s16 }
 0x44a   : > { %1009 = vrot.lane.b32.xlu0 %v924_v57, %s2146_s0  ;;  %1556 = vrot.lane.b32.xlu1 %v1555_v59, %s2146_s0  ;;  %s2189_s0 = sshll.u32 %s1834_s20, 2  ;;  %s1377_s20 = smul.u32 24, %s1817_s8 }
 0x44b   : > { %s386_s19 = scalar_lea.vmem %s2103_s3, %s2189_s0  ;;  %s1596_s0 = scalar_lea.vmem %s1595_s29, 768 }
 0x44c   : > { %s373_s11 = scalar_lea.vmem [#allocation7], %s1377_s20 }
 0x44d   : > { %s1150_s16 = sshll.u32 %s373_s11, 4  ;;  %s2058_s16 = int_to_ptr.vmem [resolvable:$true] %s1150_s16 }
 0x44e   : > { %1035 = vperm.xlu1 %1519, %v1032_v60   ;;  %s1590_s12 = scalar_lea.vmem %s2058_s16, 384  ;;  %p1597_p10 = scmp.lt.s32.totalorder %s2058_s16, %s1595_s29 }
 0x44f   : > { %p1591_p6 = scmp.ne.s32.totalorder %s2058_s16, %s1590_s12  ;;  %p1598_p2 = scmp.lt.s32.totalorder %s1596_s0, %s1590_s12 }
 0x451   : > { %p1592_p13 = pnand %p1591_p6, %p2197_p12  ;;  %p1599_p4 = por %p1598_p2, %p1597_p10 }
 0x453   : > { %p1593_p7 = pneg %p1592_p13 }
 0x455   : > { %p1600_p5 = pnand %p1599_p4, %p1593_p7 }
 0x4a0   : > { %v940_v61 = vpop.permute.xlu1 %939  ;;  %v929_v62 = vpop.permute.xlu0 %928 }
 0x4a4   : > { %v962_v63 = vpop.permute.xlu1 %961  ;;  %v951_v1 = vpop.permute.xlu0 %950 }
 0x4a8   : > { %v984_v2 = vpop.permute.xlu1 %983  ;;  %v973_v3 = vpop.permute.xlu0 %972 }
 0x4ac   : > { %v1522_v4 = vpop.permute.xlu1 %1521  ;;  %v995_v6 = vpop.permute.xlu0 %994 }
 0x4ad   : > { %v1524_v7 = vunpack.i.h.bf16 %v1522_v4  ;;  %v1523_v8 = vunpack.i.l.bf16 %v1522_v4 }
 0x4af   : > { %v1018_v9 = vpack.c.bf16 %v1524_v7, %v924_v57  ;;  %v934_v10 = vsel %vm2175_vm5, %v929_v62, %v1523_v8  ;;  %v935_v11 = vsel %vm2176_vm6, %v1523_v8, %v1524_v7  ;;  %vm2192_vm5 = vmmov %vm2190_vm4  ;;  %v1031_v62 = vld [vmem:[%s386_s19] sm:$0xf] }
 0x4b0   : > { %v1016_v12 = vpack.c.bf16 %v934_v10, %v922_v55  ;;  %v1527_v13 = vpop.permute.xlu1 %1526  ;;  %v1532_v14 = vpop.permute.xlu0 %1531  ;;  %v1017_v15 = vpack.c.bf16 %v935_v11, %v923_v56  ;;  %vm2193_vm6 = vmmov %vm2191_vm14 }
 0x4b1   : > { %v1529_v16 = vunpack.i.h.bf16 %v1527_v13  ;;  %v1528_v17 = vunpack.i.l.bf16 %v1527_v13  ;;  %v1534_v18 = vunpack.i.h.bf16 %v1532_v14  ;;  %v1533_v19 = vunpack.i.l.bf16 %v1532_v14  ;;  %1364 = vmatpush3.bf16.msra.mxu1 %v1018_v9 }
 0x4b2   : > { %1050 = vmatprep.subr.bf16.mxu0 %v1017_v15  ;;  %1365 = vmatprep.subr.bf16.mxu1 %v1659_v0 }
 0x4b3   : > { %v945_v20 = vsel %vm2177_vm8, %v940_v61, %v1528_v17  ;;  %v1021_v21 = vpack.c.bf16 %v1534_v18, %v1529_v16  ;;  %v956_v22 = vsel %vm2178_vm10, %v951_v1, %v1533_v19  ;;  %1051 = vmatpush1.bf16.msra.mxu0 %v1016_v12  ;;  %v946_v23 = vsel %vm2179_vm13, %v1528_v17, %v1529_v16  ;;  %vm2194_vm8 = vmmov %vm2193_vm6 }
 0x4b4   : > { %v1019_v24 = vpack.c.bf16 %v956_v22, %v945_v20  ;;  %v1537_v25 = vpop.permute.xlu1 %1536  ;;  %v1542_v26 = vpop.permute.xlu0 %1541  ;;  %v957_v27 = vsel %vm2180_vm15, %v1533_v19, %v1534_v18  ;;  %vm2195_vm10 = vcmask 588800   ;;  %vm1133_vm15 = vcmask 556032  }
 0x4b5   : > { %v1539_v28 = vunpack.i.h.bf16 %v1537_v25  ;;  %v1538_v29 = vunpack.i.l.bf16 %v1537_v25  ;;  %v1544_v30 = vunpack.i.h.bf16 %v1542_v26  ;;  %v1543_v31 = vunpack.i.l.bf16 %v1542_v26  ;;  %1366 = vmatpush3.bf16.msra.mxu1 %v1021_v21  ;;  %vm2196_vm13 = vmmov %vm2195_vm10 }
 0x4b6   : > { %v1020_v32 = vpack.c.bf16 %v957_v27, %v946_v23  ;;  %1367 = vmatprep.subr.bf16.mxu1 %v1659_v0 }
 0x4b7   : > { %v967_v33 = vsel %vm2181_vm9, %v962_v63, %v1538_v29  ;;  %v1024_v34 = vpack.c.bf16 %v1544_v30, %v1539_v28  ;;  %v978_v35 = vsel %vm2182_vm2, %v973_v3, %v1543_v31  ;;  %v968_v36 = vsel %vm2183_vm11, %v1538_v29, %v1539_v28 }
 0x4b8   : > { %v1022_v37 = vpack.c.bf16 %v978_v35, %v967_v33  ;;  %1052 = vmatprep.subr.bf16.mxu0 %v1020_v32  ;;  %v1547_v38 = vpop.permute.xlu1 %1546  ;;  %v1552_v39 = vpop.permute.xlu0 %1551  ;;  %v979_v40 = vsel %vm2184_vm3, %v1543_v31, %v1544_v30 }
 0x4b9   : > { %1053 = vmatpush1.bf16.msra.mxu0 %v1019_v24  ;;  %v1549_v41 = vunpack.i.h.bf16 %v1547_v38  ;;  %v1548_v42 = vunpack.i.l.bf16 %v1547_v38  ;;  %v1554_v43 = vunpack.i.h.bf16 %v1552_v39  ;;  %v1553_v44 = vunpack.i.l.bf16 %v1552_v39  ;;  %1368 = vmatpush3.bf16.msra.mxu1 %v1024_v34 }
 0x4ba   : > { %v1023_v45 = vpack.c.bf16 %v979_v40, %v968_v36  ;;  %1369 = vmatprep.subr.bf16.mxu1 %v1659_v0 }
 0x4bb   : > { %v989_v46 = vsel %vm2185_vm0, %v984_v2, %v1548_v42  ;;  %v1027_v47 = vpack.c.bf16 %v1554_v43, %v1549_v41  ;;  %v1000_v48 = vsel %vm2186_vm1, %v995_v6, %v1553_v44  ;;  %v990_v49 = vsel %vm2187_vm7, %v1548_v42, %v1549_v41 }
 0x4bc   : > { %v1025_v50 = vpack.c.bf16 %v1000_v48, %v989_v46  ;;  %1054 = vmatprep.subr.bf16.mxu0 %v1023_v45  ;;  %v1557_v51 = vpop.permute.xlu1 %1556  ;;  %v1010_v5 = vpop.permute.xlu0 %1009  ;;  %v1001_v52 = vsel %vm2188_vm12, %v1553_v44, %v1554_v43 }
 0x4bd   : > { %1055 = vmatpush1.bf16.msra.mxu0 %v1022_v37  ;;  %v1559_v53 = vunpack.i.h.bf16 %v1557_v51  ;;  %v1558_v54 = vunpack.i.l.bf16 %v1557_v51  ;;  %v1030_v55 = vpack.c.bf16 %v1010_v5, %v1010_v5  ;;  %1370 = vmatpush3.bf16.msra.mxu1 %v1027_v47  ;;  %v1026_v56 = vpack.c.bf16 %v1001_v52, %v990_v49 }
 0x4be   : > { %1371 = vmatprep.subr.bf16.mxu1 %v1659_v0 }
 0x4bf   : > { %v1012_v57 = vsel %vm2190_vm4, %v1559_v53, %v1010_v5  ;;  %v1048_v58 = vsel %vm2191_vm14, %v1030_v55, 0  ;;  %1056 = vmatprep.subr.bf16.mxu0 %v1026_v56  ;;  %v1011_v59 = vsel %vm2192_vm5, %v1558_v54, %v1559_v53 }
 0x4c0   : > { %v1029_v60 = vpack.c.bf16 %v1012_v57, %v1012_v57  ;;  %v1028_v61 = vpack.c.bf16 %v1011_v59, %v1011_v59 }
 0x4c1   : > { %1057 = vmatpush1.bf16.msra.mxu0 %v1025_v50  ;;  %1372 = vmatpush3.bf16.msra.mxu1 %v1048_v58 }
 0x4c2   : > { %1311 = vmatprep.subr.msk.bf16.mxu0 %vm2193_vm6, %v1029_v60  ;;  %v1042_v63 = vsel %vm2194_vm8, %v1028_v61, 0 }
 0x4c4   : > { %1374 = vmatmul.mubr.msk.bf16.vlgmr.msra.gmra.mrb[8].mxu1 %vm2195_vm10, %v1031_v62 }
 0x4c5   : > { %1059 = vmatpush1.bf16.msra.mxu0 %v1042_v63 }
 0x4c8   : > { %1312 = vmatmul.mubr.msk.bf16.vlgmr.msra.gmra.mrb[8].mxu0 %vm2196_vm13, %v1031_v62 }
 0x4cd   : > { %v1036_v0 = vpop.permute.xlu1 %1035 }
 0x597   : > { %v1125_v1 = vpop.f32.mrb[8].mxu1 }
 0x598   : > { %v1126_v2 = vadd.f32 %v1125_v1, %v1036_v0  ;;  %v1375_v3 = vpop.f32.mrb[9].mxu1 }
 0x599   : > { %v1128_v4 = vpop.f32.mrb[10].mxu1 }
 0x59a   : > { %1134 = vst.msk [vmem:[%s373_s11 + $0x10] sm:$0xff] %vm1133_vm15, %v1126_v2  ;;  %v1376_v6 = vpop.f32.mrb[11].mxu1 }
 0x59b   : > { %v1084_v7 = vpop.f32.mrb[8].mxu0 }
 0x59c   : > { %v1085_v8 = vadd.f32 %v1084_v7, %v1036_v0  ;;  %v1086_v9 = vpop.f32.mrb[9].mxu0 }
 0x59d   : > { %v1087_v10 = vadd.f32 %v1086_v9, %v1036_v0  ;;  %v1088_v11 = vpop.f32.mrb[10].mxu0 }
 0x59e   : > { %1131 = vst [vmem:[%s373_s11] sm:$0xff] %v1085_v8  ;;  %v1089_v12 = vpop.f32.mrb[11].mxu0 }
 0x59f   : > { %1132 = vst [vmem:[%s373_s11 + $0x8] sm:$0xff] %v1087_v10 }
 0x5a0   : > { %1603 = shalt.err (!%p1600_p5)
}
 0x5a1   : > { %s1604_s8 = scalar_lea.hbm %s2056_s17, 384  ;;  %s1608_s19 = scalar_lea.hbm %s2107_s7, 768 }
 0x5a2   : > { %p1605_p8 = scmp.ne.s32.totalorder %s2056_s17, %s1604_s8  ;;  %p1609_p1 = scmp.lt.u32.totalorder %s2056_s17, %s2107_s7 }
 0x5a3   : > { %p1610_p3 = scmp.lt.u32.totalorder %s1608_s19, %s1604_s8  ;;  %p1612_p6 = scmp.lt.u32.totalorder %s1604_s8, %s2056_s17 }
 0x5a4   : > { %p1606_p9 = pnand %p1605_p8, %p2197_p12 }
 0x5a5   : > { %p1611_p11 = por %p1610_p3, %p1609_p1 }
 0x5a6   : > { %p1607_p0 = pneg %p1606_p9 }
 0x5a7   : > { %p1613_p13 = por %p1612_p6, %p1611_p11 }
 0x5a9   : > { %p1614_p7 = pnand %p1613_p13, %p1607_p0 }
 0x5ab   : > { %1617 = shalt.err (!%p1614_p7)
}
 0x5ac   : > { %1382 = dma.vmem_to_hbm [thread:$0]  (%p2197_p12), %s2058_s16, 384, %s2056_s17, %s1136_s28  }
 0x5ad PF: > { %s1162_s11 = sand.u32 1, %s1644_s24   ;;  %p2198_p10 = scmp.ne.s32.totalorder %s2140_s14, 0 }
 0x5ae   : > { %p2199_p2 = scmp.ge.s32.totalorder %s1656_s27, 2  ;;  %s1163_s22 = scalar_lea.sflag [#allocation6], %s1162_s11 }
 0x5b0   : > { %p1389_p4 = pnand %p2199_p2, %p2198_p10 }
 0x5b2   : > { %1639 = dma.done.wait (!%p1389_p4), %s1163_s22, 384  }
 0x5b3   : > { %1641 = vsyncadd (!%p1389_p4), %s1163_s22, 4294966912  ;;  %p20_p5 = scmp.ge.s32.totalorder %s1737_s30, 4   ;;  %s2200_s24 = smov %s1648_s25 }
 0x5b4   : > { %s2201_s25 = smov %s1652_s26  ;;  %s2202_s26 = smov %s1749_s10 }
 0x5b5   : > { %s2203_s27 = smov %s1737_s30  ;;  %22 = sbr.rel (!%p20_p5) target bundleno = 7 (0x7), region = 111 }
 0x5bc   :  { %1168 = vsyncpa [#allocation5], 1 }
 0x5bd   :  { %1170 = vsyncpa [#allocation5 + $0x1], 1 }
 0x5be   :  { %1171 = vsyncpa [#allocation6], 1 }
 0x5bf   :  { %1173 = vsyncpa [#allocation6 + $0x1], 1 }

</bundles_post_ra>
